<compile_context>
chip_gen: v7x
topology: tpu7x:2x2x1
jax: 0.10.0
libtpu: 0.0.40
codegen_flags: <defaults>
</compile_context>

<pallas_src>
import functools

import jax
import jax.numpy as jnp
import numpy as np
from jax.experimental import pallas as pl
from jax.experimental.pallas import tpu as pltpu


def _taylor_kernel(coords_ref, hm_ref, out_ref, *, grid_type, flip, height, width):
    B = hm_ref.shape[0]
    hm = hm_ref[...]                                   # (B, H, W) f32 (raw, no log yet)

    # ---- coordinate -> pixel space (vectorized over the batch) ------------------
    cx = coords_ref[:, 0:1]                            # (B, 1)
    cy = coords_ref[:, 1:2]                            # (B, 1)
    if grid_type == "ndc":
        x = (cx + 1.0) * 0.5 * width
        y = (cy + 1.0) * 0.5 * height
    elif grid_type == "norm":
        x = cx * width
        y = cy * height
    else:  # 'coord'
        x = cx
        y = cy

    px = x.astype(jnp.int32)   # truncation toward zero, like Python int()
    py = y.astype(jnp.int32)

    # ---- stage 1: rows py-2 .. py+2 via sublane masks + sublane reductions -------
    # Masks are built at (B, H, 1) (tiny) and broadcast along lanes; the reduction is
    # over axis=1 (sublanes), producing lane-dense (B, W) strips.  No (B, H, W) iota.
    h_idx = jax.lax.broadcasted_iota(jnp.int32, (B, height, 1), 1)
    rel_h = h_idx - py[:, :, None]                     # (B, H, 1)

    def row(dy):
        m = rel_h == dy                                # (B, H, 1)
        return jnp.sum(jnp.where(m, hm, 0.0), axis=1)  # (B, W) = hm[:, py+dy, :]

    r_m2, r_m1, r_0, r_p1, r_p2 = row(-2), row(-1), row(0), row(1), row(2)

    # ---- stage 2: 13 taps at px+dx on the small strips; log only on the taps -----
    # When in-bounds each masked sum selects exactly one element, so per-tap
    # zero-replace + log is numerically identical to logging the whole heatmap.
    w_idx = jax.lax.broadcasted_iota(jnp.int32, (B, width), 1)
    rel_w = w_idx - px                                 # (B, W)
    lane_mask = {dx: (rel_w == dx) for dx in (-2, -1, 0, 1, 2)}

    def tap(strip, dx):
        v = jnp.sum(jnp.where(lane_mask[dx], strip, 0.0), axis=1, keepdims=True)  # (B, 1)
        v = jnp.where(v == 0.0, jnp.float32(1e-10), v)
        return jnp.log(v)

    t_00 = tap(r_0, 0)                                 # center tap, reused by dxx/dyy
    d1x = 0.5 * (tap(r_0, 1) - tap(r_0, -1))
    d1y = 0.5 * (tap(r_p1, 0) - tap(r_m1, 0))
    dxx = 0.25 * (tap(r_0, 2) - 2.0 * t_00 + tap(r_0, -2))
    dxy = 0.25 * (tap(r_p1, 1) - tap(r_p1, -1) - tap(r_m1, 1) + tap(r_m1, -1))
    dyy = 0.25 * (tap(r_p2, 0) - 2.0 * t_00 + tap(r_m2, 0))

    det = dxx * dyy - dxy * dxy
    in_bounds = (px > 1) & (px < width - 2) & (py > 1) & (py < height - 2)
    apply_off = jnp.logical_and(in_bounds, det != 0.0)          # (B, 1) bool
    safe_det = jnp.where(apply_off, det, jnp.float32(1.0))
    inv_det = 1.0 / safe_det

    # offset = -H^{-1} @ [d1x, d1y]^T  (2x2 adjugate inverse)
    off_x = -(dyy * d1x - dxy * d1y) * inv_det
    off_y = -(-dxy * d1x + dxx * d1y) * inv_det

    x = jnp.where(apply_off, x + off_x, x)                      # (B, 1)
    y = jnp.where(apply_off, y + off_y, y)                      # (B, 1)

    # ---- pixel -> output grid ----------------------------------------------------
    if grid_type == "ndc":
        x = x / width * 2.0 - 1.0
        y = y / height * 2.0 - 1.0
    elif grid_type == "norm":
        x = x / width
        y = y / height

    first = y if flip else x
    second = x if flip else y
    out_ref[:, 0:1] = first.astype(out_ref.dtype)
    out_ref[:, 1:2] = second.astype(out_ref.dtype)


def _round_up(a, b):
    return -(-a // b) * b


def taylor_pallas(coords, heatmaps, grid_type="ndc", flip=True, block_points=None):
    N, P, H, W = heatmaps.shape
    NP = N * P

    if block_points is None:
        # Per-point VMEM bytes per grid step: heatmap row (H*W f32) plus the lane-padded
        # coord and output block rows ((1,2) -> (1,128) f32 each).  ~6 MiB per step,
        # double-buffered, leaves headroom for the masked-select temporaries within the
        # explicit 32 MiB vmem limit (safe on v5e/v6e/v7x).
        bytes_per_point = H * W * 4 + 2 * 128 * 4
        cap = max(8, ((6 * 1024 * 1024) // bytes_per_point) // 8 * 8)
        # Keep at least 2 grid steps when NP allows it so v7x's 2 TensorCores both work.
        half = max(8, ((_round_up(NP, 8) // 2) // 8) * 8)
        block_points = min(cap, half)
    block_points = max(8, (block_points // 8) * 8)
    NP_pad = _round_up(NP, block_points)
    num_blocks = NP_pad // block_points

    coords_f = coords.reshape(NP, 2).astype(jnp.float32)
    hms = heatmaps.reshape(NP, H, W).astype(jnp.float32)
    if NP_pad != NP:
        # Padded points: zero coords + all-zero heatmaps -> det == 0 -> no offset; sliced off.
        coords_f = jnp.pad(coords_f, ((0, NP_pad - NP), (0, 0)))
        hms = jnp.pad(hms, ((0, NP_pad - NP), (0, 0), (0, 0)))

    kernel = functools.partial(
        _taylor_kernel, grid_type=grid_type, flip=flip, height=H, width=W
    )
    out = pl.pallas_call(
        kernel,
        out_shape=jax.ShapeDtypeStruct((NP_pad, 2), jnp.float32),
        grid=(num_blocks,),
        in_specs=[
            pl.BlockSpec((block_points, 2), lambda i: (i, 0)),        # coords block
            pl.BlockSpec((block_points, H, W), lambda i: (i, 0, 0)),  # heatmap block
        ],
        out_specs=pl.BlockSpec((block_points, 2), lambda i: (i, 0)),  # per-step output
        compiler_params=pltpu.CompilerParams(
            dimension_semantics=("parallel",),
            vmem_limit_bytes=32 * 1024 * 1024,
        ),
    )(coords_f, hms)
    return out[:NP].reshape(N, P, 2)


# ----------------------------- pure numpy reference ---------------------------------
def taylor_ref(coords, heatmaps, grid_type="ndc", flip=True):
    c = np.array(coords, dtype=np.float32).copy()
    hms = np.array(heatmaps, dtype=np.float32).copy()
    N, P, H, W = hms.shape
    if grid_type != "coord":
        if grid_type == "ndc":
            c[..., 0] = (c[..., 0] + 1.0) / 2.0 * W
            c[..., 1] = (c[..., 1] + 1.0) / 2.0 * H
        else:
            c[..., 0] = c[..., 0] * W
            c[..., 1] = c[..., 1] * H
    hms[hms == 0] = 1e-10
    lhm = np.log(hms)
    for n in range(N):
        for p in range(P):
            px = int(c[n, p, 0])
            py = int(c[n, p, 1])
            hm = lhm[n, p]
            if 1 < px < W - 2 and 1 < py < H - 2:
                dx = 0.5 * (hm[py][px + 1] - hm[py][px - 1])
                dy = 0.5 * (hm[py + 1][px] - hm[py - 1][px])
                dxx = 0.25 * (hm[py][px + 2] - 2 * hm[py][px] + hm[py][px - 2])
                dxy = 0.25 * (hm[py + 1][px + 1] - hm[py - 1][px + 1]
                              - hm[py + 1][px - 1] + hm[py - 1][px - 1])
                dyy = 0.25 * (hm[py + 2][px] - 2 * hm[py][px] + hm[py - 2][px])
                det = dxx * dyy - dxy * dxy
                if det != 0:
                    inv = np.array([[dyy, -dxy], [-dxy, dxx]], np.float64) / det
                    off = -inv @ np.array([dx, dy], np.float64)
                    c[n, p, 0] += off[0]
                    c[n, p, 1] += off[1]
    if grid_type == "ndc":
        c[..., 0] = c[..., 0] / W * 2.0 - 1.0
        c[..., 1] = c[..., 1] / H * 2.0 - 1.0
    elif grid_type == "norm":
        c[..., 0] = c[..., 0] / W
        c[..., 1] = c[..., 1] / H
    return c[..., ::-1].copy() if flip else c


if __name__ == "__main__":
    N, P, H, W = 2, 4, 16, 16
    key = jax.random.PRNGKey(0)
    k_ctr, k_noise = jax.random.split(key)

    # Gaussian-blob heatmaps with peaks away from the border (well-conditioned Hessian).
    centers = np.array(
        jax.random.uniform(k_ctr, (N, P, 2), minval=4.0, maxval=float(W - 5))
    )  # (N, P, 2) in pixel (x, y)
    xs = np.arange(W, dtype=np.float32)[None, :]
    ys = np.arange(H, dtype=np.float32)[:, None]
    sigma = 1.5
    hm_np = np.zeros((N, P, H, W), dtype=np.float32)
    for n in range(N):
        for p in range(P):
            cxp, cyp = centers[n, p]
            hm_np[n, p] = np.exp(
                -((xs - cxp) ** 2 + (ys - cyp) ** 2) / (2.0 * sigma ** 2)
            ).astype(np.float32)

    # Coords near the blob centers (in NDC), perturbed so the Taylor step does work.
    noise = np.array(jax.random.uniform(k_noise, (N, P, 2), minval=-1.5, maxval=1.5))
    coords_px = centers + noise
    coords_ndc = np.empty_like(coords_px, dtype=np.float32)
    coords_ndc[..., 0] = coords_px[..., 0] / W * 2.0 - 1.0
    coords_ndc[..., 1] = coords_px[..., 1] / H * 2.0 - 1.0

    coords_j = jnp.asarray(coords_ndc, dtype=jnp.float32)
    heatmaps_j = jnp.asarray(hm_np, dtype=jnp.float32)

    out = taylor_pallas(coords_j, heatmaps_j, grid_type="ndc", flip=True)
    out = jax.block_until_ready(out)

    ref = taylor_ref(coords_ndc, hm_np, grid_type="ndc", flip=True)
    np.testing.assert_allclose(np.array(out), ref, rtol=1e-3, atol=1e-3)

    print("KERNEL_OK")
</pallas_src>

<mosaic_0001>
module attributes {stable_mosaic.version = 11 : i64} {
  func.func @_taylor_kernel(%arg0: i32, %arg1: memref<8x2xf32, #tpu.memory_space<vmem>>, %arg2: memref<8x16x16xf32, #tpu.memory_space<vmem>>, %arg3: memref<8x2xf32, #tpu.memory_space<vmem>>) attributes {dimension_semantics = [#tpu.dimension_semantics<parallel>], iteration_bounds = array<i64: 1>, scalar_prefetch = 0 : i64, scratch_operands = 0 : i64, tpu.core_type = #tpu.core_type<tc>, window_params = [{transform_indices = @transform_0, window_bounds = array<i64: 8, 2>}, {transform_indices = @transform_1, window_bounds = array<i64: 8, 16, 16>}, {transform_indices = @transform_2, window_bounds = array<i64: 8, 2>}]} {
    %c0 = arith.constant 0 : index
    %c0_0 = arith.constant 0 : index
    %c0_1 = arith.constant 0 : index
    %0 = vector.load %arg2[%c0, %c0_0, %c0_1] : memref<8x16x16xf32, #tpu.memory_space<vmem>>, vector<8x16x16xf32>
    %c0_2 = arith.constant 0 : index
    %c0_3 = arith.constant 0 : index
    %1 = vector.load %arg1[%c0_2, %c0_3] : memref<8x2xf32, #tpu.memory_space<vmem>>, vector<8x1xf32>
    %c0_4 = arith.constant 0 : index
    %c1 = arith.constant 1 : index
    %2 = vector.load %arg1[%c0_4, %c1] : memref<8x2xf32, #tpu.memory_space<vmem>>, vector<8x1xf32>
    %cst = arith.constant 1.000000e+00 : f32
    %3 = vector.broadcast %cst : f32 to vector<8x1xf32>
    %4 = arith.addf %1, %3 : vector<8x1xf32>
    %cst_5 = arith.constant 5.000000e-01 : f32
    %5 = vector.broadcast %cst_5 : f32 to vector<8x1xf32>
    %6 = arith.mulf %4, %5 : vector<8x1xf32>
    %cst_6 = arith.constant 1.600000e+01 : f32
    %7 = vector.broadcast %cst_6 : f32 to vector<8x1xf32>
    %8 = arith.mulf %6, %7 : vector<8x1xf32>
    %cst_7 = arith.constant 1.000000e+00 : f32
    %9 = vector.broadcast %cst_7 : f32 to vector<8x1xf32>
    %10 = arith.addf %2, %9 : vector<8x1xf32>
    %cst_8 = arith.constant 5.000000e-01 : f32
    %11 = vector.broadcast %cst_8 : f32 to vector<8x1xf32>
    %12 = arith.mulf %10, %11 : vector<8x1xf32>
    %cst_9 = arith.constant 1.600000e+01 : f32
    %13 = vector.broadcast %cst_9 : f32 to vector<8x1xf32>
    %14 = arith.mulf %12, %13 : vector<8x1xf32>
    %15 = arith.fptosi %8 : vector<8x1xf32> to vector<8x1xi32>
    %16 = arith.fptosi %14 : vector<8x1xf32> to vector<8x1xi32>
    %17 = tpu.iota {dimensions = array<i32: 1>} : vector<8x16x1xi32>
    %18 = vector.shape_cast %16 : vector<8x1xi32> to vector<8x1x1xi32>
    %19 = vector.broadcast %18 : vector<8x1x1xi32> to vector<8x16x1xi32>
    %20 = arith.subi %17, %19 : vector<8x16x1xi32>
    %c-2_i32 = arith.constant -2 : i32
    %21 = vector.broadcast %c-2_i32 : i32 to vector<8x16x1xi32>
    %22 = arith.cmpi eq, %20, %21 : vector<8x16x1xi32>
    %cst_10 = arith.constant 0.000000e+00 : f32
    %23 = vector.shape_cast %22 : vector<8x16x1xi1> to vector<8x16x1xi1>
    %24 = vector.broadcast %23 : vector<8x16x1xi1> to vector<8x16x16xi1>
    %25 = vector.broadcast %cst_10 : f32 to vector<8x16x16xf32>
    %26 = arith.select %24, %0, %25 : vector<8x16x16xi1>, vector<8x16x16xf32>
    %cst_11 = arith.constant dense<0.000000e+00> : vector<8x16xf32>
    %27 = vector.multi_reduction <add>, %26, %cst_11 [1] : vector<8x16x16xf32> to vector<8x16xf32>
    %c-1_i32 = arith.constant -1 : i32
    %28 = vector.broadcast %c-1_i32 : i32 to vector<8x16x1xi32>
    %29 = arith.cmpi eq, %20, %28 : vector<8x16x1xi32>
    %cst_12 = arith.constant 0.000000e+00 : f32
    %30 = vector.shape_cast %29 : vector<8x16x1xi1> to vector<8x16x1xi1>
    %31 = vector.broadcast %30 : vector<8x16x1xi1> to vector<8x16x16xi1>
    %32 = vector.broadcast %cst_12 : f32 to vector<8x16x16xf32>
    %33 = arith.select %31, %0, %32 : vector<8x16x16xi1>, vector<8x16x16xf32>
    %cst_13 = arith.constant dense<0.000000e+00> : vector<8x16xf32>
    %34 = vector.multi_reduction <add>, %33, %cst_13 [1] : vector<8x16x16xf32> to vector<8x16xf32>
    %c0_i32 = arith.constant 0 : i32
    %35 = vector.broadcast %c0_i32 : i32 to vector<8x16x1xi32>
    %36 = arith.cmpi eq, %20, %35 : vector<8x16x1xi32>
    %cst_14 = arith.constant 0.000000e+00 : f32
    %37 = vector.shape_cast %36 : vector<8x16x1xi1> to vector<8x16x1xi1>
    %38 = vector.broadcast %37 : vector<8x16x1xi1> to vector<8x16x16xi1>
    %39 = vector.broadcast %cst_14 : f32 to vector<8x16x16xf32>
    %40 = arith.select %38, %0, %39 : vector<8x16x16xi1>, vector<8x16x16xf32>
    %cst_15 = arith.constant dense<0.000000e+00> : vector<8x16xf32>
    %41 = vector.multi_reduction <add>, %40, %cst_15 [1] : vector<8x16x16xf32> to vector<8x16xf32>
    %c1_i32 = arith.constant 1 : i32
    %42 = vector.broadcast %c1_i32 : i32 to vector<8x16x1xi32>
    %43 = arith.cmpi eq, %20, %42 : vector<8x16x1xi32>
    %cst_16 = arith.constant 0.000000e+00 : f32
    %44 = vector.shape_cast %43 : vector<8x16x1xi1> to vector<8x16x1xi1>
    %45 = vector.broadcast %44 : vector<8x16x1xi1> to vector<8x16x16xi1>
    %46 = vector.broadcast %cst_16 : f32 to vector<8x16x16xf32>
    %47 = arith.select %45, %0, %46 : vector<8x16x16xi1>, vector<8x16x16xf32>
    %cst_17 = arith.constant dense<0.000000e+00> : vector<8x16xf32>
    %48 = vector.multi_reduction <add>, %47, %cst_17 [1] : vector<8x16x16xf32> to vector<8x16xf32>
    %c2_i32 = arith.constant 2 : i32
    %49 = vector.broadcast %c2_i32 : i32 to vector<8x16x1xi32>
    %50 = arith.cmpi eq, %20, %49 : vector<8x16x1xi32>
    %cst_18 = arith.constant 0.000000e+00 : f32
    %51 = vector.shape_cast %50 : vector<8x16x1xi1> to vector<8x16x1xi1>
    %52 = vector.broadcast %51 : vector<8x16x1xi1> to vector<8x16x16xi1>
    %53 = vector.broadcast %cst_18 : f32 to vector<8x16x16xf32>
    %54 = arith.select %52, %0, %53 : vector<8x16x16xi1>, vector<8x16x16xf32>
    %cst_19 = arith.constant dense<0.000000e+00> : vector<8x16xf32>
    %55 = vector.multi_reduction <add>, %54, %cst_19 [1] : vector<8x16x16xf32> to vector<8x16xf32>
    %56 = tpu.iota {dimensions = array<i32: 1>} : vector<8x16xi32>
    %57 = vector.broadcast %15 : vector<8x1xi32> to vector<8x16xi32>
    %58 = arith.subi %56, %57 : vector<8x16xi32>
    %c-2_i32_20 = arith.constant -2 : i32
    %59 = vector.broadcast %c-2_i32_20 : i32 to vector<8x16xi32>
    %60 = arith.cmpi eq, %58, %59 : vector<8x16xi32>
    %c-1_i32_21 = arith.constant -1 : i32
    %61 = vector.broadcast %c-1_i32_21 : i32 to vector<8x16xi32>
    %62 = arith.cmpi eq, %58, %61 : vector<8x16xi32>
    %c0_i32_22 = arith.constant 0 : i32
    %63 = vector.broadcast %c0_i32_22 : i32 to vector<8x16xi32>
    %64 = arith.cmpi eq, %58, %63 : vector<8x16xi32>
    %c1_i32_23 = arith.constant 1 : i32
    %65 = vector.broadcast %c1_i32_23 : i32 to vector<8x16xi32>
    %66 = arith.cmpi eq, %58, %65 : vector<8x16xi32>
    %c2_i32_24 = arith.constant 2 : i32
    %67 = vector.broadcast %c2_i32_24 : i32 to vector<8x16xi32>
    %68 = arith.cmpi eq, %58, %67 : vector<8x16xi32>
    %cst_25 = arith.constant 0.000000e+00 : f32
    %69 = vector.broadcast %cst_25 : f32 to vector<8x16xf32>
    %70 = arith.select %64, %41, %69 : vector<8x16xi1>, vector<8x16xf32>
    %cst_26 = arith.constant dense<0.000000e+00> : vector<8xf32>
    %71 = vector.multi_reduction <add>, %70, %cst_26 [1] : vector<8x16xf32> to vector<8xf32>
    %72 = vector.shape_cast %71 : vector<8xf32> to vector<8x1xf32>
    %cst_27 = arith.constant 0.000000e+00 : f32
    %73 = vector.broadcast %cst_27 : f32 to vector<8x1xf32>
    %74 = arith.cmpf oeq, %72, %73 : vector<8x1xf32>
    %cst_28 = arith.constant 1.000000e-10 : f32
    %75 = vector.broadcast %cst_28 : f32 to vector<8x1xf32>
    %76 = arith.select %74, %75, %72 : vector<8x1xi1>, vector<8x1xf32>
    %77 = math.log %76 : vector<8x1xf32>
    %cst_29 = arith.constant 0.000000e+00 : f32
    %78 = vector.broadcast %cst_29 : f32 to vector<8x16xf32>
    %79 = arith.select %66, %41, %78 : vector<8x16xi1>, vector<8x16xf32>
    %cst_30 = arith.constant dense<0.000000e+00> : vector<8xf32>
    %80 = vector.multi_reduction <add>, %79, %cst_30 [1] : vector<8x16xf32> to vector<8xf32>
    %81 = vector.shape_cast %80 : vector<8xf32> to vector<8x1xf32>
    %cst_31 = arith.constant 0.000000e+00 : f32
    %82 = vector.broadcast %cst_31 : f32 to vector<8x1xf32>
    %83 = arith.cmpf oeq, %81, %82 : vector<8x1xf32>
    %cst_32 = arith.constant 1.000000e-10 : f32
    %84 = vector.broadcast %cst_32 : f32 to vector<8x1xf32>
    %85 = arith.select %83, %84, %81 : vector<8x1xi1>, vector<8x1xf32>
    %86 = math.log %85 : vector<8x1xf32>
    %cst_33 = arith.constant 0.000000e+00 : f32
    %87 = vector.broadcast %cst_33 : f32 to vector<8x16xf32>
    %88 = arith.select %62, %41, %87 : vector<8x16xi1>, vector<8x16xf32>
    %cst_34 = arith.constant dense<0.000000e+00> : vector<8xf32>
    %89 = vector.multi_reduction <add>, %88, %cst_34 [1] : vector<8x16xf32> to vector<8xf32>
    %90 = vector.shape_cast %89 : vector<8xf32> to vector<8x1xf32>
    %cst_35 = arith.constant 0.000000e+00 : f32
    %91 = vector.broadcast %cst_35 : f32 to vector<8x1xf32>
    %92 = arith.cmpf oeq, %90, %91 : vector<8x1xf32>
    %cst_36 = arith.constant 1.000000e-10 : f32
    %93 = vector.broadcast %cst_36 : f32 to vector<8x1xf32>
    %94 = arith.select %92, %93, %90 : vector<8x1xi1>, vector<8x1xf32>
    %95 = math.log %94 : vector<8x1xf32>
    %96 = arith.subf %86, %95 : vector<8x1xf32>
    %cst_37 = arith.constant 5.000000e-01 : f32
    %97 = vector.broadcast %cst_37 : f32 to vector<8x1xf32>
    %98 = arith.mulf %97, %96 : vector<8x1xf32>
    %cst_38 = arith.constant 0.000000e+00 : f32
    %99 = vector.broadcast %cst_38 : f32 to vector<8x16xf32>
    %100 = arith.select %64, %48, %99 : vector<8x16xi1>, vector<8x16xf32>
    %cst_39 = arith.constant dense<0.000000e+00> : vector<8xf32>
    %101 = vector.multi_reduction <add>, %100, %cst_39 [1] : vector<8x16xf32> to vector<8xf32>
    %102 = vector.shape_cast %101 : vector<8xf32> to vector<8x1xf32>
    %cst_40 = arith.constant 0.000000e+00 : f32
    %103 = vector.broadcast %cst_40 : f32 to vector<8x1xf32>
    %104 = arith.cmpf oeq, %102, %103 : vector<8x1xf32>
    %cst_41 = arith.constant 1.000000e-10 : f32
    %105 = vector.broadcast %cst_41 : f32 to vector<8x1xf32>
    %106 = arith.select %104, %105, %102 : vector<8x1xi1>, vector<8x1xf32>
    %107 = math.log %106 : vector<8x1xf32>
    %cst_42 = arith.constant 0.000000e+00 : f32
    %108 = vector.broadcast %cst_42 : f32 to vector<8x16xf32>
    %109 = arith.select %64, %34, %108 : vector<8x16xi1>, vector<8x16xf32>
    %cst_43 = arith.constant dense<0.000000e+00> : vector<8xf32>
    %110 = vector.multi_reduction <add>, %109, %cst_43 [1] : vector<8x16xf32> to vector<8xf32>
    %111 = vector.shape_cast %110 : vector<8xf32> to vector<8x1xf32>
    %cst_44 = arith.constant 0.000000e+00 : f32
    %112 = vector.broadcast %cst_44 : f32 to vector<8x1xf32>
    %113 = arith.cmpf oeq, %111, %112 : vector<8x1xf32>
    %cst_45 = arith.constant 1.000000e-10 : f32
    %114 = vector.broadcast %cst_45 : f32 to vector<8x1xf32>
    %115 = arith.select %113, %114, %111 : vector<8x1xi1>, vector<8x1xf32>
    %116 = math.log %115 : vector<8x1xf32>
    %117 = arith.subf %107, %116 : vector<8x1xf32>
    %cst_46 = arith.constant 5.000000e-01 : f32
    %118 = vector.broadcast %cst_46 : f32 to vector<8x1xf32>
    %119 = arith.mulf %118, %117 : vector<8x1xf32>
    %cst_47 = arith.constant 0.000000e+00 : f32
    %120 = vector.broadcast %cst_47 : f32 to vector<8x16xf32>
    %121 = arith.select %68, %41, %120 : vector<8x16xi1>, vector<8x16xf32>
    %cst_48 = arith.constant dense<0.000000e+00> : vector<8xf32>
    %122 = vector.multi_reduction <add>, %121, %cst_48 [1] : vector<8x16xf32> to vector<8xf32>
    %123 = vector.shape_cast %122 : vector<8xf32> to vector<8x1xf32>
    %cst_49 = arith.constant 0.000000e+00 : f32
    %124 = vector.broadcast %cst_49 : f32 to vector<8x1xf32>
    %125 = arith.cmpf oeq, %123, %124 : vector<8x1xf32>
    %cst_50 = arith.constant 1.000000e-10 : f32
    %126 = vector.broadcast %cst_50 : f32 to vector<8x1xf32>
    %127 = arith.select %125, %126, %123 : vector<8x1xi1>, vector<8x1xf32>
    %128 = math.log %127 : vector<8x1xf32>
    %cst_51 = arith.constant 2.000000e+00 : f32
    %129 = vector.broadcast %cst_51 : f32 to vector<8x1xf32>
    %130 = arith.mulf %129, %77 : vector<8x1xf32>
    %131 = arith.subf %128, %130 : vector<8x1xf32>
    %cst_52 = arith.constant 0.000000e+00 : f32
    %132 = vector.broadcast %cst_52 : f32 to vector<8x16xf32>
    %133 = arith.select %60, %41, %132 : vector<8x16xi1>, vector<8x16xf32>
    %cst_53 = arith.constant dense<0.000000e+00> : vector<8xf32>
    %134 = vector.multi_reduction <add>, %133, %cst_53 [1] : vector<8x16xf32> to vector<8xf32>
    %135 = vector.shape_cast %134 : vector<8xf32> to vector<8x1xf32>
    %cst_54 = arith.constant 0.000000e+00 : f32
    %136 = vector.broadcast %cst_54 : f32 to vector<8x1xf32>
    %137 = arith.cmpf oeq, %135, %136 : vector<8x1xf32>
    %cst_55 = arith.constant 1.000000e-10 : f32
    %138 = vector.broadcast %cst_55 : f32 to vector<8x1xf32>
    %139 = arith.select %137, %138, %135 : vector<8x1xi1>, vector<8x1xf32>
    %140 = math.log %139 : vector<8x1xf32>
    %141 = arith.addf %131, %140 : vector<8x1xf32>
    %cst_56 = arith.constant 2.500000e-01 : f32
    %142 = vector.broadcast %cst_56 : f32 to vector<8x1xf32>
    %143 = arith.mulf %142, %141 : vector<8x1xf32>
    %cst_57 = arith.constant 0.000000e+00 : f32
    %144 = vector.broadcast %cst_57 : f32 to vector<8x16xf32>
    %145 = arith.select %66, %48, %144 : vector<8x16xi1>, vector<8x16xf32>
    %cst_58 = arith.constant dense<0.000000e+00> : vector<8xf32>
    %146 = vector.multi_reduction <add>, %145, %cst_58 [1] : vector<8x16xf32> to vector<8xf32>
    %147 = vector.shape_cast %146 : vector<8xf32> to vector<8x1xf32>
    %cst_59 = arith.constant 0.000000e+00 : f32
    %148 = vector.broadcast %cst_59 : f32 to vector<8x1xf32>
    %149 = arith.cmpf oeq, %147, %148 : vector<8x1xf32>
    %cst_60 = arith.constant 1.000000e-10 : f32
    %150 = vector.broadcast %cst_60 : f32 to vector<8x1xf32>
    %151 = arith.select %149, %150, %147 : vector<8x1xi1>, vector<8x1xf32>
    %152 = math.log %151 : vector<8x1xf32>
    %cst_61 = arith.constant 0.000000e+00 : f32
    %153 = vector.broadcast %cst_61 : f32 to vector<8x16xf32>
    %154 = arith.select %62, %48, %153 : vector<8x16xi1>, vector<8x16xf32>
    %cst_62 = arith.constant dense<0.000000e+00> : vector<8xf32>
    %155 = vector.multi_reduction <add>, %154, %cst_62 [1] : vector<8x16xf32> to vector<8xf32>
    %156 = vector.shape_cast %155 : vector<8xf32> to vector<8x1xf32>
    %cst_63 = arith.constant 0.000000e+00 : f32
    %157 = vector.broadcast %cst_63 : f32 to vector<8x1xf32>
    %158 = arith.cmpf oeq, %156, %157 : vector<8x1xf32>
    %cst_64 = arith.constant 1.000000e-10 : f32
    %159 = vector.broadcast %cst_64 : f32 to vector<8x1xf32>
    %160 = arith.select %158, %159, %156 : vector<8x1xi1>, vector<8x1xf32>
    %161 = math.log %160 : vector<8x1xf32>
    %162 = arith.subf %152, %161 : vector<8x1xf32>
    %cst_65 = arith.constant 0.000000e+00 : f32
    %163 = vector.broadcast %cst_65 : f32 to vector<8x16xf32>
    %164 = arith.select %66, %34, %163 : vector<8x16xi1>, vector<8x16xf32>
    %cst_66 = arith.constant dense<0.000000e+00> : vector<8xf32>
    %165 = vector.multi_reduction <add>, %164, %cst_66 [1] : vector<8x16xf32> to vector<8xf32>
    %166 = vector.shape_cast %165 : vector<8xf32> to vector<8x1xf32>
    %cst_67 = arith.constant 0.000000e+00 : f32
    %167 = vector.broadcast %cst_67 : f32 to vector<8x1xf32>
    %168 = arith.cmpf oeq, %166, %167 : vector<8x1xf32>
    %cst_68 = arith.constant 1.000000e-10 : f32
    %169 = vector.broadcast %cst_68 : f32 to vector<8x1xf32>
    %170 = arith.select %168, %169, %166 : vector<8x1xi1>, vector<8x1xf32>
    %171 = math.log %170 : vector<8x1xf32>
    %172 = arith.subf %162, %171 : vector<8x1xf32>
    %cst_69 = arith.constant 0.000000e+00 : f32
    %173 = vector.broadcast %cst_69 : f32 to vector<8x16xf32>
    %174 = arith.select %62, %34, %173 : vector<8x16xi1>, vector<8x16xf32>
    %cst_70 = arith.constant dense<0.000000e+00> : vector<8xf32>
    %175 = vector.multi_reduction <add>, %174, %cst_70 [1] : vector<8x16xf32> to vector<8xf32>
    %176 = vector.shape_cast %175 : vector<8xf32> to vector<8x1xf32>
    %cst_71 = arith.constant 0.000000e+00 : f32
    %177 = vector.broadcast %cst_71 : f32 to vector<8x1xf32>
    %178 = arith.cmpf oeq, %176, %177 : vector<8x1xf32>
    %cst_72 = arith.constant 1.000000e-10 : f32
    %179 = vector.broadcast %cst_72 : f32 to vector<8x1xf32>
    %180 = arith.select %178, %179, %176 : vector<8x1xi1>, vector<8x1xf32>
    %181 = math.log %180 : vector<8x1xf32>
    %182 = arith.addf %172, %181 : vector<8x1xf32>
    %cst_73 = arith.constant 2.500000e-01 : f32
    %183 = vector.broadcast %cst_73 : f32 to vector<8x1xf32>
    %184 = arith.mulf %183, %182 : vector<8x1xf32>
    %cst_74 = arith.constant 0.000000e+00 : f32
    %185 = vector.broadcast %cst_74 : f32 to vector<8x16xf32>
    %186 = arith.select %64, %55, %185 : vector<8x16xi1>, vector<8x16xf32>
    %cst_75 = arith.constant dense<0.000000e+00> : vector<8xf32>
    %187 = vector.multi_reduction <add>, %186, %cst_75 [1] : vector<8x16xf32> to vector<8xf32>
    %188 = vector.shape_cast %187 : vector<8xf32> to vector<8x1xf32>
    %cst_76 = arith.constant 0.000000e+00 : f32
    %189 = vector.broadcast %cst_76 : f32 to vector<8x1xf32>
    %190 = arith.cmpf oeq, %188, %189 : vector<8x1xf32>
    %cst_77 = arith.constant 1.000000e-10 : f32
    %191 = vector.broadcast %cst_77 : f32 to vector<8x1xf32>
    %192 = arith.select %190, %191, %188 : vector<8x1xi1>, vector<8x1xf32>
    %193 = math.log %192 : vector<8x1xf32>
    %cst_78 = arith.constant 2.000000e+00 : f32
    %194 = vector.broadcast %cst_78 : f32 to vector<8x1xf32>
    %195 = arith.mulf %194, %77 : vector<8x1xf32>
    %196 = arith.subf %193, %195 : vector<8x1xf32>
    %cst_79 = arith.constant 0.000000e+00 : f32
    %197 = vector.broadcast %cst_79 : f32 to vector<8x16xf32>
    %198 = arith.select %64, %27, %197 : vector<8x16xi1>, vector<8x16xf32>
    %cst_80 = arith.constant dense<0.000000e+00> : vector<8xf32>
    %199 = vector.multi_reduction <add>, %198, %cst_80 [1] : vector<8x16xf32> to vector<8xf32>
    %200 = vector.shape_cast %199 : vector<8xf32> to vector<8x1xf32>
    %cst_81 = arith.constant 0.000000e+00 : f32
    %201 = vector.broadcast %cst_81 : f32 to vector<8x1xf32>
    %202 = arith.cmpf oeq, %200, %201 : vector<8x1xf32>
    %cst_82 = arith.constant 1.000000e-10 : f32
    %203 = vector.broadcast %cst_82 : f32 to vector<8x1xf32>
    %204 = arith.select %202, %203, %200 : vector<8x1xi1>, vector<8x1xf32>
    %205 = math.log %204 : vector<8x1xf32>
    %206 = arith.addf %196, %205 : vector<8x1xf32>
    %cst_83 = arith.constant 2.500000e-01 : f32
    %207 = vector.broadcast %cst_83 : f32 to vector<8x1xf32>
    %208 = arith.mulf %207, %206 : vector<8x1xf32>
    %209 = arith.mulf %143, %208 : vector<8x1xf32>
    %210 = arith.mulf %184, %184 : vector<8x1xf32>
    %211 = arith.subf %209, %210 : vector<8x1xf32>
    %c1_i32_84 = arith.constant 1 : i32
    %212 = vector.broadcast %c1_i32_84 : i32 to vector<8x1xi32>
    %213 = arith.cmpi sgt, %15, %212 : vector<8x1xi32>
    %c14_i32 = arith.constant 14 : i32
    %214 = vector.broadcast %c14_i32 : i32 to vector<8x1xi32>
    %215 = arith.cmpi slt, %15, %214 : vector<8x1xi32>
    %216 = arith.andi %213, %215 : vector<8x1xi1>
    %c1_i32_85 = arith.constant 1 : i32
    %217 = vector.broadcast %c1_i32_85 : i32 to vector<8x1xi32>
    %218 = arith.cmpi sgt, %16, %217 : vector<8x1xi32>
    %219 = arith.andi %216, %218 : vector<8x1xi1>
    %c14_i32_86 = arith.constant 14 : i32
    %220 = vector.broadcast %c14_i32_86 : i32 to vector<8x1xi32>
    %221 = arith.cmpi slt, %16, %220 : vector<8x1xi32>
    %222 = arith.andi %219, %221 : vector<8x1xi1>
    %cst_87 = arith.constant 0.000000e+00 : f32
    %223 = vector.broadcast %cst_87 : f32 to vector<8x1xf32>
    %224 = arith.cmpf one, %211, %223 : vector<8x1xf32>
    %225 = arith.andi %222, %224 : vector<8x1xi1>
    %cst_88 = arith.constant 1.000000e+00 : f32
    %226 = vector.broadcast %cst_88 : f32 to vector<8x1xf32>
    %227 = arith.select %225, %211, %226 : vector<8x1xi1>, vector<8x1xf32>
    %cst_89 = arith.constant 1.000000e+00 : f32
    %228 = vector.broadcast %cst_89 : f32 to vector<8x1xf32>
    %229 = arith.divf %228, %227 : vector<8x1xf32>
    %230 = arith.mulf %208, %98 : vector<8x1xf32>
    %231 = arith.mulf %184, %119 : vector<8x1xf32>
    %232 = arith.subf %230, %231 : vector<8x1xf32>
    %cst_90 = arith.constant 0.000000e+00 : f32
    %233 = vector.broadcast %cst_90 : f32 to vector<8x1xf32>
    %234 = arith.subf %233, %232 : vector<8x1xf32>
    %235 = arith.mulf %234, %229 : vector<8x1xf32>
    %cst_91 = arith.constant 0.000000e+00 : f32
    %236 = vector.broadcast %cst_91 : f32 to vector<8x1xf32>
    %237 = arith.subf %236, %184 : vector<8x1xf32>
    %238 = arith.mulf %237, %98 : vector<8x1xf32>
    %239 = arith.mulf %143, %119 : vector<8x1xf32>
    %240 = arith.addf %238, %239 : vector<8x1xf32>
    %cst_92 = arith.constant 0.000000e+00 : f32
    %241 = vector.broadcast %cst_92 : f32 to vector<8x1xf32>
    %242 = arith.subf %241, %240 : vector<8x1xf32>
    %243 = arith.mulf %242, %229 : vector<8x1xf32>
    %244 = arith.addf %8, %235 : vector<8x1xf32>
    %245 = arith.select %225, %244, %8 : vector<8x1xi1>, vector<8x1xf32>
    %246 = arith.addf %14, %243 : vector<8x1xf32>
    %247 = arith.select %225, %246, %14 : vector<8x1xi1>, vector<8x1xf32>
    %cst_93 = arith.constant 1.600000e+01 : f32
    %248 = vector.broadcast %cst_93 : f32 to vector<8x1xf32>
    %249 = arith.divf %245, %248 : vector<8x1xf32>
    %cst_94 = arith.constant 2.000000e+00 : f32
    %250 = vector.broadcast %cst_94 : f32 to vector<8x1xf32>
    %251 = arith.mulf %249, %250 : vector<8x1xf32>
    %cst_95 = arith.constant 1.000000e+00 : f32
    %252 = vector.broadcast %cst_95 : f32 to vector<8x1xf32>
    %253 = arith.subf %251, %252 : vector<8x1xf32>
    %cst_96 = arith.constant 1.600000e+01 : f32
    %254 = vector.broadcast %cst_96 : f32 to vector<8x1xf32>
    %255 = arith.divf %247, %254 : vector<8x1xf32>
    %cst_97 = arith.constant 2.000000e+00 : f32
    %256 = vector.broadcast %cst_97 : f32 to vector<8x1xf32>
    %257 = arith.mulf %255, %256 : vector<8x1xf32>
    %cst_98 = arith.constant 1.000000e+00 : f32
    %258 = vector.broadcast %cst_98 : f32 to vector<8x1xf32>
    %259 = arith.subf %257, %258 : vector<8x1xf32>
    %c0_99 = arith.constant 0 : index
    %c0_100 = arith.constant 0 : index
    %260 = vector.load %arg3[%c0_99, %c0_100] : memref<8x2xf32, #tpu.memory_space<vmem>>, vector<8x1xf32>
    tpu.vector_store %arg3[%c0_99, %c0_100], %259 {strides = array<i32>} : memref<8x2xf32, #tpu.memory_space<vmem>>, vector<8x1xf32>,
    %c0_101 = arith.constant 0 : index
    %c1_102 = arith.constant 1 : index
    %261 = vector.load %arg3[%c0_101, %c1_102] : memref<8x2xf32, #tpu.memory_space<vmem>>, vector<8x1xf32>
    tpu.vector_store %arg3[%c0_101, %c1_102], %253 {strides = array<i32>} : memref<8x2xf32, #tpu.memory_space<vmem>>, vector<8x1xf32>,
    return
  }
  func.func @transform_0(%arg0: i32) -> (i32, i32) {
    %c0_i32 = arith.constant 0 : i32
    %c0_i32_0 = arith.constant 0 : i32
    return %arg0, %c0_i32 : i32, i32
  }
  func.func @transform_1(%arg0: i32) -> (i32, i32, i32) {
    %c0_i32 = arith.constant 0 : i32
    %c0_i32_0 = arith.constant 0 : i32
    %c0_i32_1 = arith.constant 0 : i32
    return %arg0, %c0_i32, %c0_i32_0 : i32, i32, i32
  }
  func.func @transform_2(%arg0: i32) -> (i32, i32) {
    %c0_i32 = arith.constant 0 : i32
    %c0_i32_0 = arith.constant 0 : i32
    return %arg0, %c0_i32 : i32, i32
  }
}

</mosaic_0001>

<bundles_post_ra>
// kernel: tpu_custom_call.1
= control target key start
LH: loop header
LB: loop body
LE: loop exit
PB: predicated region body
PF: predicated region fallthrough
CT: control target
= control target key end

     0   :  { %7 = vsyncpa [#allocation3], 0  ;;  %s1419_s9 = smov [#allocation2]   ;;  %s2084_s0 = inlined_call_operand.vmem [shape: f32[8,2], index: 0, kind: input, shape index: {}]   ;;  %s2085_s1 = inlined_call_operand.hbm [shape: f32[8,16,16], index: 1, kind: input, shape index: {}]   ;;  %s2086_s2 = inlined_call_operand.vmem [shape: f32[8,2], index: 2, kind: output, shape index: {}]  }
   0x1   :  { %s15_s10 = sshll.u32 %s1419_s9, 4  ;;  %s1395_s13 = scalar_lea.hbm %s2085_s1, 2048  ;;  %s16_s10 = int_to_ptr.vmem [resolvable:$true] %s15_s10 }
   0x2   :  { %p1396_p0 = scmp.ne.s32.totalorder %s2085_s1, %s1395_s13  ;;  %p1399_p1 = scmp.lt.u32.totalorder %s1395_s13, %s2085_s1 }
   0x4   :  { %p1401_p2 = pnand %p1399_p1, %p1396_p0 }
   0x6   :  { %1404 = shalt.err (!%p1401_p2)
}
   0x7   :  { %s1405_s18 = scalar_lea.vmem %s16_s10, 2048  ;;  %p1410_p4 = scmp.lt.s32.totalorder %s16_s10, %s16_s10 }
   0x8   :  { %p1406_p3 = scmp.ne.s32.totalorder %s16_s10, %s1405_s18  ;;  %p1411_p5 = scmp.lt.s32.totalorder %s1405_s18, %s1405_s18 }
   0xa   :  { %p1412_p6 = por %p1411_p5, %p1410_p4 }
   0xc   :  { %p1413_p7 = pnand %p1412_p6, %p1406_p3 }
   0xe   :  { %1416 = shalt.err (!%p1413_p7)
}
   0xf   :  { %s1420_s19 = smov 128   ;;  %s1421_s20 = smov 8  }
  0x10   :  { %21 = dma.hbm_to_vmem [thread:$0]  %s2085_s1, 2048, %s16_s10, [#allocation3], %s1420_s19, %s1420_s19, %s1421_s20  }
  0x11   :  { %1417 = dma.done.wait [#allocation3], 2048  }
  0x12   :  { %1418 = vsyncadd [#allocation3], 4294965248  ;;  %v1422_v0 = vmov 1   ;;  %v46_v1 = vlaneseq  ;;  %v1423_v2 = vmov 1966171168   ;;  %v41_v4 = vld [vmem:[%s2084_s0] sm:$0xff] }
  0x13   :  { %1365 = vset.pattern.permute.xlu1 %v1422_v0  ;;  %1364 = vset.pattern.permute.xlu0 %v1422_v0  ;;  %v51_v3 = vunpack.c.l.s4 %v1423_v2  ;;  %v42_v5 = vadd.f32 1.0, %v41_v4  ;;  %v1424_v29 = vmov 0   ;;  %s1425_s0 = smov 127   ;;  %s1426_s1 = smov 1  }
  0x14   :  { %v1458_v7 = vshrl.u32 %v46_v1, 7 }
  0x15   :  { %v43_v6 = vmul.f32 0.5, %v42_v5  ;;  %v52_v8 = vunpack.c.0.s8 %v51_v3 }
  0x16   :  { %v1468_v14 = vsub.s32 0, %v1458_v7  ;;  %v1473_v16 = vadd.s32 8, %v1458_v7 }
  0x17   :  { %v1460_v9 = vmul.f32 16.0, %v43_v6  ;;  %v55_v11 = vsub.s32 %v52_v8, %v1458_v7 }
  0x19   :  { %v1354_v10 = vtrunc.f32 %v1460_v9 }
  0x1b   :  { %v1464_v12 = vcvt.f32.s32 %v1354_v10 }
  0x1d   :  { %v56_v13 = vrot.slane %v1464_v12, %v55_v11  ;;  %v49_v15 = vcombine.high %v1464_v12, %v1464_v12 }
  0x1f   :  { %v72_v17 = vrot.slane %v56_v13, %v55_v11  ;;  %v64_v18 = vcombine.high %v56_v13, %v56_v13  ;;  %v63_v19 = vrot.slane %v49_v15, %v55_v11 }
  0x21   :  { %v101_v20 = vrot.slane %v72_v17, %v1468_v14  ;;  %v86_v21 = vrot.slane %v64_v18, %v55_v11  ;;  %v94_v22 = vcombine.high %v72_v17, %v72_v17  ;;  %v79_v27 = vrot.slane %v63_v19, %v55_v11 }
  0x22   :  { %v65_v41 = vcombine.high %v63_v19, %v63_v19 }
  0x23   :  { %v1477_v23 = vsub.s32 %v1473_v16, %v101_v20  ;;  %v1480_v24 = vsub.s32 %v1458_v7, %v101_v20  ;;  %v105_v25 = vrot.slane %v86_v21, %v1468_v14  ;;  %v109_v26 = vrot.slane %v94_v22, %v1468_v14 }
  0x24   :  { %v117_v35 = vrot.slane %v79_v27, %v1468_v14  ;;  %v96_v40 = vcombine.high %v86_v21, %v86_v21  ;;  %v93_v47 = vrot.slane %v65_v41, %v55_v11  ;;  %v95_v50 = vcombine.high %v79_v27, %v79_v27 }
  0x25   :  { %vm516_vm0 = vcmp.eq.s32.totalorder %v1477_v23, 0  ;;  %vm146_vm1 = vcmp.eq.s32.totalorder %v1480_v24, 4294967294  ;;  %vm147_vm2 = vcmp.eq.s32.totalorder %v1477_v23, 4294967294  ;;  %v1488_v28 = vsub.s32 %v1458_v7, %v105_v25 }
  0x26   :  { %v532_v30 = vsel %vm516_vm0, 1, %v1424_v29  ;;  %v162_v31 = vsel %vm146_vm1, 1, %v1424_v29  ;;  %v1494_v32 = vsub.s32 %v1473_v16, %v105_v25  ;;  %v163_v33 = vsel %vm147_vm2, 1, %v1424_v29 }
  0x27   :  { %551 = vperm.xlu1 %1365, %v532_v30   ;;  %179 = vperm.xlu0 %1364, %v162_v31   ;;  %vm148_vm3 = vcmp.eq.s32.totalorder %v1488_v28, 4294967294  ;;  %vm515_vm4 = vcmp.eq.s32.totalorder %v1480_v24, 0  ;;  %v1502_v36 = vsub.s32 %v1458_v7, %v109_v26  ;;  %v1505_v37 = vsub.s32 %v1473_v16, %v109_v26 }
  0x28   :  { %v164_v34 = vsel %vm148_vm3, 1, %v1424_v29  ;;  %vm149_vm5 = vcmp.eq.s32.totalorder %v1494_v32, 4294967294  ;;  %v531_v38 = vsel %vm515_vm4, 1, %v1424_v29  ;;  %v1512_v42 = vsub.s32 %v1473_v16, %v117_v35 }
  0x29   :  { %v165_v39 = vsel %vm149_vm5, 1, %v1424_v29  ;;  %vm150_vm6 = vcmp.eq.s32.totalorder %v1502_v36, 4294967294  ;;  %vm151_vm7 = vcmp.eq.s32.totalorder %v1505_v37, 4294967294  ;;  %v1515_v43 = vsub.s32 %v1458_v7, %v117_v35 }
  0x2a   :  { %v166_v44 = vsel %vm150_vm6, 1, %v1424_v29  ;;  %v167_v45 = vsel %vm151_vm7, 1, %v1424_v29  ;;  %vm155_vm8 = vcmp.eq.s32.totalorder %v1512_v42, 4294967294  ;;  %v113_v46 = vrot.slane %v96_v40, %v1468_v14 }
  0x2b   :  { %182 = vperm.xlu0 %1364, %v163_v33   ;;  %185 = vperm.xlu1 %1365, %v164_v34   ;;  %vm154_vm9 = vcmp.eq.s32.totalorder %v1515_v43, 4294967294  ;;  %v171_v48 = vsel %vm155_vm8, 1, %v1424_v29  ;;  %vm518_vm10 = vcmp.eq.s32.totalorder %v1494_v32, 0  ;;  %vm517_vm11 = vcmp.eq.s32.totalorder %v1488_v28, 0 }
  0x2c   :  { %v170_v49 = vsel %vm154_vm9, 1, %v1424_v29  ;;  %v1527_v51 = vsub.s32 %v1473_v16, %v113_v46  ;;  %v1530_v52 = vsub.s32 %v1458_v7, %v113_v46  ;;  %v121_v53 = vrot.slane %v93_v47, %v1468_v14 }
  0x2d   :  { %v534_v54 = vsel %vm518_vm10, 1, %v1424_v29  ;;  %v533_v55 = vsel %vm517_vm11, 1, %v1424_v29  ;;  %v125_v56 = vrot.slane %v95_v50, %v1468_v14  ;;  %vm700_vm2 = vcmp.eq.s32.totalorder %v1477_v23, 1 }
  0x2e   :  { %vm153_vm12 = vcmp.eq.s32.totalorder %v1527_v51, 4294967294  ;;  %vm152_vm13 = vcmp.eq.s32.totalorder %v1530_v52, 4294967294  ;;  %v1539_v57 = vsub.s32 %v1473_v16, %v121_v53  ;;  %v1542_v58 = vsub.s32 %v1458_v7, %v121_v53 }
  0x2f   :  { %548 = vperm.xlu0 %1364, %v531_v38   ;;  %188 = vperm.xlu1 %1365, %v165_v39   ;;  %v169_v59 = vsel %vm153_vm12, 1, %v1424_v29  ;;  %v168_v60 = vsel %vm152_vm13, 1, %v1424_v29  ;;  %v1549_v61 = vsub.s32 %v1473_v16, %v125_v56  ;;  %v1552_v62 = vsub.s32 %v1458_v7, %v125_v56 }
  0x30   :  { %vm157_vm14 = vcmp.eq.s32.totalorder %v1539_v57, 4294967294  ;;  %vm156_vm15 = vcmp.eq.s32.totalorder %v1542_v58, 4294967294  ;;  %vm699_vm3 = vcmp.eq.s32.totalorder %v1480_v24, 1  ;;  %v716_v4 = vsel %vm700_vm2, 1, %v1424_v29 }
  0x31   :  { %v173_v63 = vsel %vm157_vm14, 1, %v1424_v29  ;;  %v172_v0 = vsel %vm156_vm15, 1, %v1424_v29  ;;  %vm159_vm0 = vcmp.eq.s32.totalorder %v1549_v61, 4294967294  ;;  %vm158_vm1 = vcmp.eq.s32.totalorder %v1552_v62, 4294967294 }
  0x32   :  { %v175_v2 = vsel %vm159_vm0, 1, %v1424_v29  ;;  %v174_v3 = vsel %vm158_vm1, 1, %v1424_v29  ;;  %v715_v5 = vsel %vm699_vm3, 1, %v1424_v29  ;;  %v97_v6 = vcombine.high %v93_v47, %v93_v47 }
  0x33   :  { %191 = vperm.xlu0 %1364, %v166_v44   ;;  %194 = vperm.xlu1 %1365, %v167_v45   ;;  %vm702_vm4 = vcmp.eq.s32.totalorder %v1494_v32, 1  ;;  %vm701_vm5 = vcmp.eq.s32.totalorder %v1488_v28, 1  ;;  %vm520_vm6 = vcmp.eq.s32.totalorder %v1505_v37, 0  ;;  %vm519_vm7 = vcmp.eq.s32.totalorder %v1502_v36, 0 }
  0x34   :  { %v129_v8 = vrot.slane %v97_v6, %v1468_v14  ;;  %v718_v10 = vsel %vm702_vm4, 1, %v1424_v29  ;;  %v717_v11 = vsel %vm701_vm5, 1, %v1424_v29  ;;  %v536_v14 = vsel %vm520_vm6, 1, %v1424_v29 }
  0x35   :  { %v535_v17 = vsel %vm519_vm7, 1, %v1424_v29  ;;  %vm704_vm8 = vcmp.eq.s32.totalorder %v1505_v37, 1  ;;  %vm703_vm9 = vcmp.eq.s32.totalorder %v1502_v36, 1  ;;  %vm332_vm10 = vcmp.eq.s32.totalorder %v1477_v23, 4294967295 }
  0x36   :  { %v1570_v13 = vsub.s32 %v1473_v16, %v129_v8  ;;  %v1573_v15 = vsub.s32 %v1458_v7, %v129_v8  ;;  %v720_v16 = vsel %vm704_vm8, 1, %v1424_v29  ;;  %v719_v7 = vsel %vm703_vm9, 1, %v1424_v29 }
  0x37   :  { %206 = vperm.xlu1 %1365, %v171_v48   ;;  %203 = vperm.xlu0 %1364, %v170_v49   ;;  %vm331_vm11 = vcmp.eq.s32.totalorder %v1480_v24, 4294967295  ;;  %v348_v18 = vsel %vm332_vm10, 1, %v1424_v29  ;;  %vm334_vm12 = vcmp.eq.s32.totalorder %v1494_v32, 4294967295  ;;  %vm333_vm13 = vcmp.eq.s32.totalorder %v1488_v28, 4294967295 }
  0x38   :  { %v347_v19 = vsel %vm331_vm11, 1, %v1424_v29  ;;  %v350_v20 = vsel %vm334_vm12, 1, %v1424_v29  ;;  %v349_v21 = vsel %vm333_vm13, 1, %v1424_v29  ;;  %vm522_vm14 = vcmp.eq.s32.totalorder %v1527_v51, 0 }
  0x39   :  { %vm521_vm15 = vcmp.eq.s32.totalorder %v1530_v52, 0  ;;  %v538_v22 = vsel %vm522_vm14, 1, %v1424_v29  ;;  %vm706_vm0 = vcmp.eq.s32.totalorder %v1527_v51, 1  ;;  %vm705_vm1 = vcmp.eq.s32.totalorder %v1530_v52, 1 }
  0x3a   :  { %v537_v25 = vsel %vm521_vm15, 1, %v1424_v29  ;;  %v722_v26 = vsel %vm706_vm0, 1, %v1424_v29  ;;  %v721_v27 = vsel %vm705_vm1, 1, %v1424_v29  ;;  %vm884_vm2 = vcmp.eq.s32.totalorder %v1477_v23, 2 }
  0x3b   :  { %557 = vperm.xlu1 %1365, %v534_v54   ;;  %554 = vperm.xlu0 %1364, %v533_v55   ;;  %vm883_vm3 = vcmp.eq.s32.totalorder %v1480_v24, 2  ;;  %v900_v30 = vsel %vm884_vm2, 1, %v1424_v29  ;;  %vm886_vm4 = vcmp.eq.s32.totalorder %v1494_v32, 2  ;;  %vm885_vm5 = vcmp.eq.s32.totalorder %v1488_v28, 2 }
  0x3c   :  { %v899_v31 = vsel %vm883_vm3, 1, %v1424_v29  ;;  %v902_v33 = vsel %vm886_vm4, 1, %v1424_v29  ;;  %v901_v34 = vsel %vm885_vm5, 1, %v1424_v29  ;;  %vm336_vm6 = vcmp.eq.s32.totalorder %v1505_v37, 4294967295 }
  0x3d   :  { %vm335_vm7 = vcmp.eq.s32.totalorder %v1502_v36, 4294967295  ;;  %v352_v23 = vsel %vm336_vm6, 1, %v1424_v29  ;;  %vm524_vm8 = vcmp.eq.s32.totalorder %v1512_v42, 0  ;;  %vm523_vm9 = vcmp.eq.s32.totalorder %v1515_v43, 0 }
  0x3e   :  { %v351_v24 = vsel %vm335_vm7, 1, %v1424_v29  ;;  %v540_v28 = vsel %vm524_vm8, 1, %v1424_v29  ;;  %v539_v32 = vsel %vm523_vm9, 1, %v1424_v29  ;;  %vm708_vm10 = vcmp.eq.s32.totalorder %v1512_v42, 1 }
  0x3f   :  { %200 = vperm.xlu1 %1365, %v169_v59   ;;  %197 = vperm.xlu0 %1364, %v168_v60   ;;  %vm707_vm11 = vcmp.eq.s32.totalorder %v1515_v43, 1  ;;  %v724_v35 = vsel %vm708_vm10, 1, %v1424_v29  ;;  %vm888_vm12 = vcmp.eq.s32.totalorder %v1505_v37, 2  ;;  %vm887_vm13 = vcmp.eq.s32.totalorder %v1502_v36, 2 }
  0x40   :  { %v723_v38 = vsel %vm707_vm11, 1, %v1424_v29  ;;  %v904_v39 = vsel %vm888_vm12, 1, %v1424_v29  ;;  %v903_v40 = vsel %vm887_vm13, 1, %v1424_v29  ;;  %vm338_vm14 = vcmp.eq.s32.totalorder %v1527_v51, 4294967295 }
  0x41   :  { %vm337_vm15 = vcmp.eq.s32.totalorder %v1530_v52, 4294967295  ;;  %v354_v41 = vsel %vm338_vm14, 1, %v1424_v29  ;;  %vm526_vm0 = vcmp.eq.s32.totalorder %v1539_v57, 0  ;;  %vm525_vm1 = vcmp.eq.s32.totalorder %v1542_v58, 0 }
  0x42   :  { %v353_v44 = vsel %vm337_vm15, 1, %v1424_v29  ;;  %v542_v36 = vsel %vm526_vm0, 1, %v1424_v29  ;;  %v541_v37 = vsel %vm525_vm1, 1, %v1424_v29  ;;  %vm710_vm2 = vcmp.eq.s32.totalorder %v1539_v57, 1 }
  0x43   :  { %212 = vperm.xlu1 %1365, %v173_v63   ;;  %209 = vperm.xlu0 %1364, %v172_v0   ;;  %vm709_vm3 = vcmp.eq.s32.totalorder %v1542_v58, 1  ;;  %v726_v45 = vsel %vm710_vm2, 1, %v1424_v29  ;;  %vm890_vm4 = vcmp.eq.s32.totalorder %v1527_v51, 2  ;;  %vm889_vm5 = vcmp.eq.s32.totalorder %v1530_v52, 2 }
  0x44   :  { %v725_v46 = vsel %vm709_vm3, 1, %v1424_v29  ;;  %v906_v47 = vsel %vm890_vm4, 1, %v1424_v29  ;;  %v905_v48 = vsel %vm889_vm5, 1, %v1424_v29  ;;  %vm340_vm6 = vcmp.eq.s32.totalorder %v1512_v42, 4294967295 }
  0x45   :  { %vm339_vm7 = vcmp.eq.s32.totalorder %v1515_v43, 4294967295  ;;  %v356_v49 = vsel %vm340_vm6, 1, %v1424_v29  ;;  %vm528_vm8 = vcmp.eq.s32.totalorder %v1549_v61, 0  ;;  %vm527_vm9 = vcmp.eq.s32.totalorder %v1552_v62, 0 }
  0x46   :  { %v355_v50 = vsel %vm339_vm7, 1, %v1424_v29  ;;  %v544_v51 = vsel %vm528_vm8, 1, %v1424_v29  ;;  %v543_v52 = vsel %vm527_vm9, 1, %v1424_v29  ;;  %vm712_vm10 = vcmp.eq.s32.totalorder %v1549_v61, 1 }
  0x47   :  { %218 = vperm.xlu1 %1365, %v175_v2   ;;  %215 = vperm.xlu0 %1364, %v174_v3   ;;  %vm711_vm11 = vcmp.eq.s32.totalorder %v1552_v62, 1  ;;  %v728_v53 = vsel %vm712_vm10, 1, %v1424_v29  ;;  %vm892_vm12 = vcmp.eq.s32.totalorder %v1512_v42, 2  ;;  %vm891_vm13 = vcmp.eq.s32.totalorder %v1515_v43, 2  ;;  %v1665_v2 = vld [vmem:[#allocation2] sm:$0xff] }
  0x48   :  { %v727_v54 = vsel %vm711_vm11, 1, %v1424_v29  ;;  %v908_v55 = vsel %vm892_vm12, 1, %v1424_v29  ;;  %v907_v56 = vsel %vm891_vm13, 1, %v1424_v29  ;;  %vm342_vm14 = vcmp.eq.s32.totalorder %v1539_v57, 4294967295 }
  0x49   :  { %vm341_vm15 = vcmp.eq.s32.totalorder %v1542_v58, 4294967295  ;;  %v358_v59 = vsel %vm342_vm14, 1, %v1424_v29  ;;  %vm530_vm0 = vcmp.eq.s32.totalorder %v1570_v13, 0  ;;  %vm529_vm1 = vcmp.eq.s32.totalorder %v1573_v15, 0 }
  0x4a   :  { %v357_v60 = vsel %vm341_vm15, 1, %v1424_v29  ;;  %v546_v42 = vsel %vm530_vm0, 1, %v1424_v29  ;;  %v545_v43 = vsel %vm529_vm1, 1, %v1424_v29  ;;  %vm714_vm2 = vcmp.eq.s32.totalorder %v1570_v13, 1 }
  0x4b   :  { %735 = vperm.xlu1 %1365, %v716_v4   ;;  %732 = vperm.xlu0 %1364, %v715_v5   ;;  %vm713_vm3 = vcmp.eq.s32.totalorder %v1573_v15, 1  ;;  %v730_v3 = vsel %vm714_vm2, 1, %v1424_v29  ;;  %v1669_v5 = vld [vmem:[#allocation2 + $0x8] sm:$0xff]  ;;  %vm894_vm5 = vcmp.eq.s32.totalorder %v1539_v57, 2  ;;  %vm893_vm6 = vcmp.eq.s32.totalorder %v1542_v58, 2 }
  0x4c   :  { %v729_v4 = vsel %vm713_vm3, 1, %v1424_v29  ;;  %vm258_vm7 = vcmask 130048   ;;  %vm344_vm8 = vcmp.eq.s32.totalorder %v1549_v61, 4294967295  ;;  %vm343_vm9 = vcmp.eq.s32.totalorder %v1552_v62, 4294967295 }
  0x4d   :  { %vm896_vm13 = vcmp.eq.s32.totalorder %v1549_v61, 2  ;;  %vm895_vm14 = vcmp.eq.s32.totalorder %v1552_v62, 2  ;;  %v359_v57 = vsel %vm343_vm9, 1, %v1424_v29  ;;  %vm346_vm1 = vcmp.eq.s32.totalorder %v1570_v13, 4294967295 }
  0x4e   :  { %v911_v61 = vsel %vm895_vm14, 1, %v1424_v29  ;;  %vm345_vm2 = vcmp.eq.s32.totalorder %v1573_v15, 4294967295  ;;  %vm898_vm3 = vcmp.eq.s32.totalorder %v1570_v13, 2  ;;  %vm161_vm9 = vcmp.eq.s32.totalorder %v1570_v13, 4294967294 }
  0x4f   :  { %741 = vperm.xlu1 %1365, %v718_v10   ;;  %738 = vperm.xlu0 %1364, %v717_v11   ;;  %v1676_v11 = vld [vmem:[#allocation2 + $0x10] sm:$0xff] }
  0x53   :  { %563 = vperm.xlu1 %1365, %v536_v14   ;;  %560 = vperm.xlu0 %1364, %v535_v17   ;;  %v910_v17 = vsel %vm894_vm5, 1, %v1424_v29 }
  0x57   :  { %747 = vperm.xlu1 %1365, %v720_v16   ;;  %744 = vperm.xlu0 %1364, %v719_v7   ;;  %v909_v16 = vsel %vm893_vm6, 1, %v1424_v29  ;;  %vm897_vm6 = vcmp.eq.s32.totalorder %v1573_v15, 2 }
  0x5b   :  { %367 = vperm.xlu1 %1365, %v348_v18   ;;  %364 = vperm.xlu0 %1364, %v347_v19   ;;  %v1689_v19 = vld [vmem:[#allocation2 + $0x18] sm:$0xff] }
  0x5f   :  { %373 = vperm.xlu1 %1365, %v350_v20   ;;  %370 = vperm.xlu0 %1364, %v349_v21   ;;  %v360_v20 = vsel %vm344_vm8, 1, %v1424_v29  ;;  %vm1086_vm8 = vcmask 1041409  }
  0x63   :  { %569 = vperm.xlu1 %1365, %v538_v22   ;;  %566 = vperm.xlu0 %1364, %v537_v25  }
  0x67   :  { %753 = vperm.xlu1 %1365, %v722_v26   ;;  %750 = vperm.xlu0 %1364, %v721_v27   ;;  %v912_v27 = vsel %vm896_vm13, 1, %v1424_v29 }
  0x6b   :  { %919 = vperm.xlu1 %1365, %v900_v30   ;;  %916 = vperm.xlu0 %1364, %v899_v31  }
  0x6f   :  { %925 = vperm.xlu1 %1365, %v902_v33   ;;  %922 = vperm.xlu0 %1364, %v901_v34  }
  0x73   :  { %379 = vperm.xlu1 %1365, %v352_v23   ;;  %376 = vperm.xlu0 %1364, %v351_v24  }
  0x77   :  { %575 = vperm.xlu1 %1365, %v540_v28   ;;  %572 = vperm.xlu0 %1364, %v539_v32   ;;  %v1712_v32 = vld [vmem:[#allocation2 + $0x20] sm:$0xff] }
  0x7b   :  { %759 = vperm.xlu1 %1365, %v724_v35   ;;  %756 = vperm.xlu0 %1364, %v723_v38  }
  0x7f   :  { %931 = vperm.xlu1 %1365, %v904_v39   ;;  %928 = vperm.xlu0 %1364, %v903_v40  }
  0x83   :  { %385 = vperm.xlu1 %1365, %v354_v41   ;;  %382 = vperm.xlu0 %1364, %v353_v44   ;;  %v1714_v41 = vld [vmem:[#allocation2 + $0x28] sm:$0xff]  ;;  %v362_v44 = vsel %vm346_vm1, 1, %v1424_v29  ;;  %vm1088_vm1 = vcmask 1042434  }
  0x87   :  { %581 = vperm.xlu1 %1365, %v542_v36   ;;  %578 = vperm.xlu0 %1364, %v541_v37  }
  0x8b   :  { %765 = vperm.xlu1 %1365, %v726_v45   ;;  %762 = vperm.xlu0 %1364, %v725_v46  }
  0x8f   :  { %937 = vperm.xlu1 %1365, %v906_v47   ;;  %934 = vperm.xlu0 %1364, %v905_v48  }
  0x93   :  { %391 = vperm.xlu1 %1365, %v356_v49   ;;  %388 = vperm.xlu0 %1364, %v355_v50   ;;  %v1724_v49 = vld [vmem:[#allocation2 + $0x48] sm:$0xff]  ;;  %v361_v50 = vsel %vm345_vm2, 1, %v1424_v29 }
  0x97   :  { %587 = vperm.xlu1 %1365, %v544_v51   ;;  %584 = vperm.xlu0 %1364, %v543_v52  }
  0x9b   :  { %771 = vperm.xlu1 %1365, %v728_v53   ;;  %768 = vperm.xlu0 %1364, %v727_v54  }
  0x9f   :  { %943 = vperm.xlu1 %1365, %v908_v55   ;;  %940 = vperm.xlu0 %1364, %v907_v56  }
  0xa3   :  { %397 = vperm.xlu1 %1365, %v358_v59   ;;  %394 = vperm.xlu0 %1364, %v357_v60   ;;  %v1731_v59 = vld [vmem:[#allocation2 + $0x40] sm:$0xff] }
  0xa6   :  { %v552_v63 = vpop.permute.xlu1 %551  ;;  %v180_v0 = vpop.permute.xlu0 %179 }
  0xa7   :  { %vm226_vm4 = vcmp.eq.s32.totalorder %v180_v0, 1  ;;  %593 = vperm.xlu1 %1365, %v546_v42   ;;  %590 = vperm.xlu0 %1364, %v545_v43   ;;  %vm596_vm10 = vcmp.eq.s32.totalorder %v552_v63, 1  ;;  %v914_v42 = vsel %vm898_vm3, 1, %v1424_v29  ;;  %v913_v0 = vsel %vm897_vm6, 1, %v1424_v29 }
  0xa8   :  { %v242_v6 = vsel %vm226_vm4, %v1665_v2, 0.0  ;;  %v612_v58 = vsel %vm596_vm10, %v1669_v5, 0.0  ;;  %vm1090_vm6 = vcmask 1043459  }
  0xa9   :  { %v259_v7 = vsel %vm258_vm7, %v242_v6, 0.0  ;;  %v628_v34 = vsel %vm258_vm7, %v612_v58, 0.0 }
  0xaa   :  { %v183_v8 = vpop.permute.xlu0 %182  ;;  %v186_v10 = vpop.permute.xlu1 %185 }
  0xab   :  { %vm227_vm11 = vcmp.eq.s32.totalorder %v183_v8, 1  ;;  %vm228_vm12 = vcmp.eq.s32.totalorder %v186_v10, 1  ;;  %777 = vperm.xlu1 %1365, %v730_v3   ;;  %774 = vperm.xlu0 %1364, %v729_v4   ;;  %v177_v8 = vsel %vm161_vm9, 1, %v1424_v29 }
  0xac   :  { %v243_v14 = vsel %vm227_vm11, %v1669_v5, 0.0  ;;  %v244_v22 = vsel %vm228_vm12, %v1676_v11, 0.0  ;;  %vm160_vm12 = vcmp.eq.s32.totalorder %v1573_v15, 4294967294 }
  0xad   :  { %v260_v18 = vsel %vm258_vm7, %v243_v14, 0.0  ;;  %v268_v23 = vsel %vm258_vm7, %v244_v22, 0.0  ;;  %v176_v13 = vsel %vm160_vm12, 1, %v1424_v29  ;;  %vm1094_vm12 = vcmask 1045509  }
  0xae   :  { %v261_v21 = vadd.f32 %v260_v18, %v259_v7  ;;  %v549_v25 = vpop.permute.xlu0 %548  ;;  %v189_v26 = vpop.permute.xlu1 %188 }
  0xaf   :  { %vm595_vm15 = vcmp.eq.s32.totalorder %v549_v25, 1  ;;  %vm229_vm0 = vcmp.eq.s32.totalorder %v189_v26, 1  ;;  %949 = vperm.xlu1 %1365, %v910_v17   ;;  %946 = vperm.xlu0 %1364, %v909_v16  }
  0xb0   :  { %v262_v30 = vrot.slane %v261_v21, 4  ;;  %v611_v31 = vsel %vm595_vm15, %v1665_v2, 0.0  ;;  %v245_v33 = vsel %vm229_vm0, %v1689_v19, 0.0 }
  0xb1   :  { %v627_v24 = vsel %vm258_vm7, %v611_v31, 0.0  ;;  %v269_v28 = vsel %vm258_vm7, %v245_v33, 0.0  ;;  %v1756_v31 = vld [vmem:[#allocation2 + $0x30] sm:$0xff] }
  0xb2   :  { %v263_v62 = vadd.f32 %v262_v30, %v261_v21  ;;  %v629_v35 = vadd.f32 %v628_v34, %v627_v24  ;;  %v270_v38 = vadd.f32 %v269_v28, %v268_v23  ;;  %v192_v39 = vpop.permute.xlu0 %191  ;;  %v195_v40 = vpop.permute.xlu1 %194  ;;  %v1754_v30 = vld [vmem:[#allocation2 + $0x38] sm:$0xff] }
  0xb3   :  { %vm230_vm4 = vcmp.eq.s32.totalorder %v192_v39, 1  ;;  %vm231_vm5 = vcmp.eq.s32.totalorder %v195_v40, 1  ;;  %403 = vperm.xlu1 %1365, %v360_v20   ;;  %400 = vperm.xlu0 %1364, %v359_v57  }
  0xb4   :  { %v264_v36 = vrot.slane %v263_v62, 2  ;;  %v630_v37 = vrot.slane %v629_v35, 4  ;;  %v271_v45 = vrot.slane %v270_v38, 4  ;;  %v246_v46 = vsel %vm230_vm4, %v1712_v32, 0.0 }
  0xb5   :  { %v277_v47 = vsel %vm258_vm7, %v246_v46, 0.0  ;;  %v247_v48 = vsel %vm231_vm5, %v1714_v41, 0.0 }
  0xb6   :  { %v265_v51 = vadd.f32 %v264_v36, %v263_v62  ;;  %v631_v52 = vadd.f32 %v630_v37, %v629_v35  ;;  %v272_v53 = vadd.f32 %v271_v45, %v270_v38  ;;  %v278_v54 = vsel %vm258_vm7, %v247_v48, 0.0  ;;  %v207_v55 = vpop.permute.xlu1 %206  ;;  %v204_v56 = vpop.permute.xlu0 %203  ;;  %v1765_v48 = vld [vmem:[#allocation2 + $0x50] sm:$0xff] }
  0xb7   :  { %v279_v60 = vadd.f32 %v278_v54, %v277_v47  ;;  %vm235_vm10 = vcmp.eq.s32.totalorder %v207_v55, 1  ;;  %vm234_vm11 = vcmp.eq.s32.totalorder %v204_v56, 1  ;;  %955 = vperm.xlu1 %1365, %v912_v27   ;;  %952 = vperm.xlu0 %1364, %v911_v61   ;;  %v1763_v47 = vld [vmem:[#allocation2 + $0x58] sm:$0xff] }
  0xb8   :  { %v273_v43 = vrot.slane %v272_v53, 2  ;;  %v251_v63 = vsel %vm235_vm10, %v1724_v49, 0.0  ;;  %v250_v6 = vsel %vm234_vm11, %v1731_v59, 0.0  ;;  %v266_v10 = vrot.slane %v265_v51, 1 }
  0xb9   :  { %v280_v3 = vrot.slane %v279_v60, 4  ;;  %v296_v4 = vsel %vm258_vm7, %v251_v63, 0.0  ;;  %v632_v14 = vrot.slane %v631_v52, 2  ;;  %v295_v16 = vsel %vm258_vm7, %v250_v6, 0.0 }
  0xba   :  { %v274_v17 = vadd.f32 %v273_v43, %v272_v53  ;;  %v558_v7 = vpop.permute.xlu1 %557  ;;  %v555_v18 = vpop.permute.xlu0 %554  ;;  %v297_v57 = vadd.f32 %v296_v4, %v295_v16  ;;  %v267_v33 = vadd.f32 %v266_v10, %v265_v51  ;;  %v1771_v4 = vld [vmem:[#allocation2 + $0x68] sm:$0xff]  ;;  %vm1092_vm11 = vcmask 1044484  }
  0xbb   :  { %v281_v20 = vadd.f32 %v280_v3, %v279_v60  ;;  %vm598_vm13 = vcmp.eq.s32.totalorder %v558_v7, 1  ;;  %vm597_vm14 = vcmp.eq.s32.totalorder %v555_v18, 1  ;;  %409 = vperm.xlu1 %1365, %v362_v44   ;;  %406 = vperm.xlu0 %1364, %v361_v50   ;;  %v633_v34 = vadd.f32 %v632_v14, %v631_v52  ;;  %v1774_v7 = vld [vmem:[#allocation2 + $0x60] sm:$0xff] }
  0xbc   :  { %v275_v58 = vrot.slane %v274_v17, 1  ;;  %v614_v21 = vsel %vm598_vm13, %v1689_v19, 0.0  ;;  %v613_v22 = vsel %vm597_vm14, %v1676_v11, 0.0  ;;  %v298_v26 = vrot.slane %v297_v57, 4 }
  0xbd   :  { %v282_v25 = vrot.slane %v281_v20, 2  ;;  %v637_v27 = vsel %vm258_vm7, %v614_v21, 0.0  ;;  %v636_v61 = vsel %vm258_vm7, %v613_v22, 0.0  ;;  %v634_v54 = vrot.slane %v633_v34, 1 }
  0xbe   :  { %v276_v23 = vadd.f32 %v275_v58, %v274_v17  ;;  %v638_v24 = vadd.f32 %v637_v27, %v636_v61  ;;  %v201_v28 = vpop.permute.xlu1 %200  ;;  %v198_v62 = vpop.permute.xlu0 %197  ;;  %v299_v38 = vadd.f32 %v298_v26, %v297_v57 }
  0xbf   :  { %v283_v35 = vadd.f32 %v282_v25, %v281_v20  ;;  %vm233_vm15 = vcmp.eq.s32.totalorder %v201_v28, 1  ;;  %vm232_vm0 = vcmp.eq.s32.totalorder %v198_v62, 1  ;;  %961 = vperm.xlu1 %1365, %v914_v42   ;;  %958 = vperm.xlu0 %1364, %v913_v0   ;;  %v635_v21 = vadd.f32 %v634_v54, %v633_v34 }
  0xc0   :  { %v1266_v15 = vsel %vm1086_vm8, %v276_v23, %v267_v33  ;;  %v639_v39 = vrot.slane %v638_v24, 4  ;;  %v249_v40 = vsel %vm233_vm15, %v1754_v30, 0.0  ;;  %v248_v44 = vsel %vm232_vm0, %v1756_v31, 0.0 }
  0xc1   :  { %v284_v36 = vrot.slane %v283_v35, 1  ;;  %v300_v37 = vrot.slane %v299_v38, 2  ;;  %v287_v45 = vsel %vm258_vm7, %v249_v40, 0.0  ;;  %v286_v46 = vsel %vm258_vm7, %v248_v44, 0.0 }
  0xc2   :  { %v640_v50 = vadd.f32 %v639_v39, %v638_v24  ;;  %v288_v51 = vadd.f32 %v287_v45, %v286_v46  ;;  %v213_v52 = vpop.permute.xlu1 %212  ;;  %v210_v53 = vpop.permute.xlu0 %209 }
  0xc3   :  { %v285_v55 = vadd.f32 %v284_v36, %v283_v35  ;;  %vm237_vm2 = vcmp.eq.s32.totalorder %v213_v52, 1  ;;  %vm236_vm3 = vcmp.eq.s32.totalorder %v210_v53, 1  ;;  %224 = vperm.xlu1 %1365, %v177_v8   ;;  %221 = vperm.xlu0 %1364, %v176_v13   ;;  %v301_v63 = vadd.f32 %v300_v37, %v299_v38 }
  0xc4   :  { %v641_v56 = vrot.slane %v640_v50, 2  ;;  %v289_v60 = vrot.slane %v288_v51, 4  ;;  %v253_v42 = vsel %vm237_vm2, %v1763_v47, 0.0  ;;  %v252_v43 = vsel %vm236_vm3, %v1765_v48, 0.0 }
  0xc5   :  { %v305_v0 = vsel %vm258_vm7, %v253_v42, 0.0  ;;  %v304_v3 = vsel %vm258_vm7, %v252_v43, 0.0  ;;  %v1267_v6 = vsel %vm1088_vm1, %v285_v55, %v1266_v15  ;;  %v302_v22 = vrot.slane %v301_v63, 1 }
  0xc6   :  { %v642_v10 = vadd.f32 %v641_v56, %v640_v50  ;;  %v290_v14 = vadd.f32 %v289_v60, %v288_v51  ;;  %v306_v17 = vadd.f32 %v305_v0, %v304_v3  ;;  %v219_v8 = vpop.permute.xlu1 %218  ;;  %v216_v16 = vpop.permute.xlu0 %215  ;;  %vm1096_vm2 = vcmask 1046534  }
  0xc7   :  { %vm239_vm4 = vcmp.eq.s32.totalorder %v219_v8, 1  ;;  %vm238_vm5 = vcmp.eq.s32.totalorder %v216_v16, 1  ;;  %1366 = vset.pattern.permute.xlu0 %v1424_v29  ;;  %v303_v44 = vadd.f32 %v302_v22, %v301_v63 }
  0xc8   :  { %v643_v18 = vrot.slane %v642_v10, 1  ;;  %v291_v20 = vrot.slane %v290_v14, 2  ;;  %v307_v57 = vrot.slane %v306_v17, 4  ;;  %v255_v58 = vsel %vm239_vm4, %v1771_v4, 0.0  ;;  %1070 = vperm.xlu0 %1366, %v1464_v12  }
  0xc9   :  { %v314_v13 = vsel %vm258_vm7, %v255_v58, 0.0  ;;  %v254_v25 = vsel %vm238_vm5, %v1774_v7, 0.0 }
  0xca   :  { %v644_v26 = vadd.f32 %v643_v18, %v642_v10  ;;  %v292_v27 = vadd.f32 %v291_v20, %v290_v14  ;;  %v308_v61 = vadd.f32 %v307_v57, %v306_v17  ;;  %v313_v33 = vsel %vm258_vm7, %v254_v25, 0.0  ;;  %v736_v23 = vpop.permute.xlu1 %735  ;;  %v733_v24 = vpop.permute.xlu0 %732 }
  0xcb   :  { %v315_v28 = vadd.f32 %v314_v13, %v313_v33  ;;  %vm780_vm9 = vcmp.eq.s32.totalorder %v736_v23, 1  ;;  %vm779_vm10 = vcmp.eq.s32.totalorder %v733_v24, 1 }
  0xcc   :  { %v1783_v62 = vsel %vm1086_vm8, %v644_v26, %v635_v21  ;;  %v293_v34 = vrot.slane %v292_v27, 1  ;;  %v309_v35 = vrot.slane %v308_v61, 2  ;;  %v796_v38 = vsel %vm780_vm9, %v1669_v5, 0.0 }
  0xcd   :  { %v316_v15 = vrot.slane %v315_v28, 4  ;;  %v812_v39 = vsel %vm258_vm7, %v796_v38, 0.0  ;;  %v795_v40 = vsel %vm779_vm10, %v1665_v2, 0.0 }
  0xce   :  { %v294_v36 = vadd.f32 %v293_v34, %v292_v27  ;;  %v310_v37 = vadd.f32 %v309_v35, %v308_v61  ;;  %v811_v45 = vsel %vm258_vm7, %v795_v40, 0.0  ;;  %v742_v46 = vpop.permute.xlu1 %741  ;;  %v739_v50 = vpop.permute.xlu0 %738 }
  0xcf   :  { %v317_v51 = vadd.f32 %v316_v15, %v315_v28  ;;  %v813_v52 = vadd.f32 %v812_v39, %v811_v45  ;;  %vm782_vm13 = vcmp.eq.s32.totalorder %v742_v46, 1  ;;  %vm781_vm14 = vcmp.eq.s32.totalorder %v739_v50, 1 }
  0xd0   :  { %v311_v53 = vrot.slane %v310_v37, 1  ;;  %v798_v54 = vsel %vm782_vm13, %v1689_v19, 0.0  ;;  %v797_v55 = vsel %vm781_vm14, %v1676_v11, 0.0  ;;  %v1268_v56 = vsel %vm1090_vm6, %v294_v36, %v1267_v6 }
  0xd1   :  { %v318_v60 = vrot.slane %v317_v51, 2  ;;  %v814_v42 = vrot.slane %v813_v52, 4  ;;  %v821_v43 = vsel %vm258_vm7, %v798_v54, 0.0  ;;  %v820_v63 = vsel %vm258_vm7, %v797_v55, 0.0 }
  0xd2   :  { %v312_v0 = vadd.f32 %v311_v53, %v310_v37  ;;  %v822_v3 = vadd.f32 %v821_v43, %v820_v63  ;;  %v564_v10 = vpop.permute.xlu1 %563  ;;  %v561_v14 = vpop.permute.xlu0 %560  ;;  %v1269_v17 = vsel %vm1092_vm11, %v303_v44, %v1268_v56 }
  0xd3   :  { %v319_v8 = vadd.f32 %v318_v60, %v317_v51  ;;  %v815_v16 = vadd.f32 %v814_v42, %v813_v52  ;;  %vm600_vm15 = vcmp.eq.s32.totalorder %v564_v10, 1  ;;  %vm599_vm0 = vcmp.eq.s32.totalorder %v561_v14, 1 }
  0xd4   :  { %v823_v18 = vrot.slane %v822_v3, 4  ;;  %v616_v20 = vsel %vm600_vm15, %v1714_v41, 0.0  ;;  %v615_v6 = vsel %vm599_vm0, %v1712_v32, 0.0  ;;  %v1270_v57 = vsel %vm1094_vm12, %v312_v0, %v1269_v17 }
  0xd5   :  { %v320_v58 = vrot.slane %v319_v8, 1  ;;  %v816_v21 = vrot.slane %v815_v16, 2  ;;  %v646_v22 = vsel %vm258_vm7, %v616_v20, 0.0  ;;  %v645_v13 = vsel %vm258_vm7, %v615_v6, 0.0 }
  0xd6   :  { %v824_v25 = vadd.f32 %v823_v18, %v822_v3  ;;  %v647_v26 = vadd.f32 %v646_v22, %v645_v13  ;;  %v748_v27 = vpop.permute.xlu1 %747  ;;  %v745_v61 = vpop.permute.xlu0 %744 }
  0xd7   :  { %v817_v33 = vadd.f32 %v816_v21, %v815_v16  ;;  %vm784_vm3 = vcmp.eq.s32.totalorder %v748_v27, 1  ;;  %vm783_vm4 = vcmp.eq.s32.totalorder %v745_v61, 1  ;;  %v321_v23 = vadd.f32 %v320_v58, %v319_v8 }
  0xd8   :  { %v825_v24 = vrot.slane %v824_v25, 2  ;;  %v648_v28 = vrot.slane %v647_v26, 4  ;;  %v800_v34 = vsel %vm784_vm3, %v1714_v41, 0.0  ;;  %v799_v35 = vsel %vm783_vm4, %v1712_v32, 0.0 }
  0xd9   :  { %v818_v38 = vrot.slane %v817_v33, 1  ;;  %v830_v15 = vsel %vm258_vm7, %v800_v34, 0.0  ;;  %v829_v39 = vsel %vm258_vm7, %v799_v35, 0.0  ;;  %v1805_v40 = vsel %vm1096_vm2, %v321_v23, %v1270_v57 }
  0xda   :  { %v826_v44 = vadd.f32 %v825_v24, %v824_v25  ;;  %v649_v36 = vadd.f32 %v648_v28, %v647_v26  ;;  %v831_v37 = vadd.f32 %v830_v15, %v829_v39  ;;  %v368_v45 = vpop.permute.xlu1 %367  ;;  %v365_v46 = vpop.permute.xlu0 %364 }
  0xdb   :  { %vm412_vm5 = vcmp.eq.s32.totalorder %v368_v45, 1  ;;  %vm411_vm9 = vcmp.eq.s32.totalorder %v365_v46, 1  ;;  %v819_v54 = vadd.f32 %v818_v38, %v817_v33 }
  0xdc   :  { %v827_v50 = vrot.slane %v826_v44, 1  ;;  %v650_v51 = vrot.slane %v649_v36, 2  ;;  %v832_v52 = vrot.slane %v831_v37, 4  ;;  %v428_v53 = vsel %vm412_vm5, %v1669_v5, 0.0 }
  0xdd   :  { %v444_v55 = vsel %vm258_vm7, %v428_v53, 0.0  ;;  %v427_v56 = vsel %vm411_vm9, %v1665_v2, 0.0 }
  0xde   :  { %v828_v60 = vadd.f32 %v827_v50, %v826_v44  ;;  %v651_v42 = vadd.f32 %v650_v51, %v649_v36  ;;  %v833_v43 = vadd.f32 %v832_v52, %v831_v37  ;;  %v443_v63 = vsel %vm258_vm7, %v427_v56, 0.0  ;;  %v374_v0 = vpop.permute.xlu1 %373  ;;  %v371_v3 = vpop.permute.xlu0 %370 }
  0xdf   :  { %v445_v10 = vadd.f32 %v444_v55, %v443_v63  ;;  %vm414_vm10 = vcmp.eq.s32.totalorder %v374_v0, 1  ;;  %vm413_vm13 = vcmp.eq.s32.totalorder %v371_v3, 1 }
  0xe0   :  { %v1135_v14 = vsel %vm1086_vm8, %v828_v60, %v819_v54  ;;  %v652_v17 = vrot.slane %v651_v42, 1  ;;  %v834_v8 = vrot.slane %v833_v43, 2  ;;  %v430_v16 = vsel %vm414_vm10, %v1689_v19, 0.0 }
  0xe1   :  { %v446_v18 = vrot.slane %v445_v10, 4  ;;  %v453_v20 = vsel %vm258_vm7, %v430_v16, 0.0  ;;  %v429_v6 = vsel %vm413_vm13, %v1676_v11, 0.0 }
  0xe2   :  { %v653_v57 = vadd.f32 %v652_v17, %v651_v42  ;;  %v835_v58 = vadd.f32 %v834_v8, %v833_v43  ;;  %v452_v21 = vsel %vm258_vm7, %v429_v6, 0.0  ;;  %v570_v22 = vpop.permute.xlu1 %569  ;;  %v567_v13 = vpop.permute.xlu0 %566 }
  0xe3   :  { %v447_v25 = vadd.f32 %v446_v18, %v445_v10  ;;  %v454_v26 = vadd.f32 %v453_v20, %v452_v21  ;;  %vm602_vm14 = vcmp.eq.s32.totalorder %v570_v22, 1  ;;  %vm601_vm15 = vcmp.eq.s32.totalorder %v567_v13, 1 }
  0xe4   :  { %v1818_v27 = vsel %vm1088_vm1, %v653_v57, %v1783_v62  ;;  %v836_v61 = vrot.slane %v835_v58, 1  ;;  %v618_v33 = vsel %vm602_vm14, %v1754_v30, 0.0  ;;  %v617_v23 = vsel %vm601_vm15, %v1756_v31, 0.0 }
  0xe5   :  { %v448_v24 = vrot.slane %v447_v25, 2  ;;  %v455_v28 = vrot.slane %v454_v26, 4  ;;  %v655_v34 = vsel %vm258_vm7, %v618_v33, 0.0  ;;  %v654_v35 = vsel %vm258_vm7, %v617_v23, 0.0 }
  0xe6   :  { %v837_v38 = vadd.f32 %v836_v61, %v835_v58  ;;  %v656_v15 = vadd.f32 %v655_v34, %v654_v35  ;;  %v754_v39 = vpop.permute.xlu1 %753  ;;  %v751_v44 = vpop.permute.xlu0 %750 }
  0xe7   :  { %v449_v36 = vadd.f32 %v448_v24, %v447_v25  ;;  %v456_v37 = vadd.f32 %v455_v28, %v454_v26  ;;  %vm786_vm0 = vcmp.eq.s32.totalorder %v754_v39, 1  ;;  %vm785_vm3 = vcmp.eq.s32.totalorder %v751_v44, 1 }
  0xe8   :  { %v1825_v62 = vsel %vm1088_vm1, %v837_v38, %v1135_v14  ;;  %v657_v45 = vrot.slane %v656_v15, 4  ;;  %v802_v46 = vsel %vm786_vm0, %v1754_v30, 0.0  ;;  %v801_v50 = vsel %vm785_vm3, %v1756_v31, 0.0 }
  0xe9   :  { %v457_v51 = vrot.slane %v456_v37, 2  ;;  %v839_v52 = vsel %vm258_vm7, %v802_v46, 0.0  ;;  %v838_v53 = vsel %vm258_vm7, %v801_v50, 0.0  ;;  %v450_v42 = vrot.slane %v449_v36, 1 }
  0xea   :  { %v658_v54 = vadd.f32 %v657_v45, %v656_v15  ;;  %v840_v55 = vadd.f32 %v839_v52, %v838_v53  ;;  %v920_v56 = vpop.permute.xlu1 %919  ;;  %v917_v60 = vpop.permute.xlu0 %916 }
  0xeb   :  { %v458_v43 = vadd.f32 %v457_v51, %v456_v37  ;;  %vm964_vm4 = vcmp.eq.s32.totalorder %v920_v56, 1  ;;  %vm963_vm5 = vcmp.eq.s32.totalorder %v917_v60, 1  ;;  %v451_v58 = vadd.f32 %v450_v42, %v449_v36 }
  0xec   :  { %v659_v63 = vrot.slane %v658_v54, 2  ;;  %v841_v0 = vrot.slane %v840_v55, 4  ;;  %v980_v3 = vsel %vm964_vm4, %v1669_v5, 0.0  ;;  %v979_v10 = vsel %vm963_vm5, %v1665_v2, 0.0 }
  0xed   :  { %v459_v14 = vrot.slane %v458_v43, 1  ;;  %v996_v17 = vsel %vm258_vm7, %v980_v3, 0.0  ;;  %v995_v8 = vsel %vm258_vm7, %v979_v10, 0.0 }
  0xee   :  { %v660_v16 = vadd.f32 %v659_v63, %v658_v54  ;;  %v842_v18 = vadd.f32 %v841_v0, %v840_v55  ;;  %v997_v20 = vadd.f32 %v996_v17, %v995_v8  ;;  %v926_v6 = vpop.permute.xlu1 %925  ;;  %v923_v57 = vpop.permute.xlu0 %922 }
  0xef   :  { %v460_v21 = vadd.f32 %v459_v14, %v458_v43  ;;  %vm966_vm9 = vcmp.eq.s32.totalorder %v926_v6, 1  ;;  %vm965_vm10 = vcmp.eq.s32.totalorder %v923_v57, 1 }
  0xf0   :  { %v661_v22 = vrot.slane %v660_v16, 1  ;;  %v843_v13 = vrot.slane %v842_v18, 2  ;;  %v998_v25 = vrot.slane %v997_v20, 4  ;;  %v982_v5 = vsel %vm966_vm9, %v1689_v19, 0.0 }
  0xf1   :  { %v1837_v2 = vsel %vm1086_vm8, %v460_v21, %v451_v58  ;;  %v1005_v26 = vsel %vm258_vm7, %v982_v5, 0.0  ;;  %v981_v61 = vsel %vm965_vm10, %v1676_v11, 0.0 }
  0xf2   :  { %v662_v33 = vadd.f32 %v661_v22, %v660_v16  ;;  %v844_v23 = vadd.f32 %v843_v13, %v842_v18  ;;  %v999_v24 = vadd.f32 %v998_v25, %v997_v20  ;;  %v1004_v28 = vsel %vm258_vm7, %v981_v61, 0.0  ;;  %v380_v34 = vpop.permute.xlu1 %379  ;;  %v377_v35 = vpop.permute.xlu0 %376 }
  0xf3   :  { %v1006_v38 = vadd.f32 %v1005_v26, %v1004_v28  ;;  %vm416_vm13 = vcmp.eq.s32.totalorder %v380_v34, 1  ;;  %vm415_vm14 = vcmp.eq.s32.totalorder %v377_v35, 1 }
  0xf4   :  { %v1844_v19 = vsel %vm1090_vm6, %v662_v33, %v1818_v27  ;;  %v845_v15 = vrot.slane %v844_v23, 1  ;;  %v1000_v39 = vrot.slane %v999_v24, 2  ;;  %v432_v44 = vsel %vm416_vm13, %v1714_v41, 0.0 }
  0xf5   :  { %v1007_v36 = vrot.slane %v1006_v38, 4  ;;  %v462_v11 = vsel %vm258_vm7, %v432_v44, 0.0  ;;  %v431_v37 = vsel %vm415_vm14, %v1712_v32, 0.0 }
  0xf6   :  { %v846_v45 = vadd.f32 %v845_v15, %v844_v23  ;;  %v1001_v46 = vadd.f32 %v1000_v39, %v999_v24  ;;  %v461_v50 = vsel %vm258_vm7, %v431_v37, 0.0  ;;  %v576_v51 = vpop.permute.xlu1 %575  ;;  %v573_v52 = vpop.permute.xlu0 %572 }
  0xf7   :  { %v1008_v53 = vadd.f32 %v1007_v36, %v1006_v38  ;;  %v463_v54 = vadd.f32 %v462_v11, %v461_v50  ;;  %vm604_vm15 = vcmp.eq.s32.totalorder %v576_v51, 1  ;;  %vm603_vm0 = vcmp.eq.s32.totalorder %v573_v52, 1 }
  0xf8   :  { %v1852_v27 = vsel %vm1090_vm6, %v846_v45, %v1825_v62  ;;  %v1002_v60 = vrot.slane %v1001_v46, 1  ;;  %v620_v42 = vsel %vm604_vm15, %v1724_v49, 0.0  ;;  %v619_v43 = vsel %vm603_vm0, %v1731_v59, 0.0 }
  0xf9   :  { %v1009_v55 = vrot.slane %v1008_v53, 2  ;;  %v464_v56 = vrot.slane %v463_v54, 4  ;;  %v664_v8 = vsel %vm258_vm7, %v620_v42, 0.0  ;;  %v663_v62 = vsel %vm258_vm7, %v619_v43, 0.0 }
  0xfa   :  { %v760_v63 = vpop.permute.xlu1 %759  ;;  %v757_v0 = vpop.permute.xlu0 %756  ;;  %v1003_v16 = vadd.f32 %v1002_v60, %v1001_v46  ;;  %v665_v26 = vadd.f32 %v664_v8, %v663_v62 }
  0xfb   :  { %v1010_v3 = vadd.f32 %v1009_v55, %v1008_v53  ;;  %v465_v10 = vadd.f32 %v464_v56, %v463_v54  ;;  %vm788_vm3 = vcmp.eq.s32.totalorder %v760_v63, 1  ;;  %vm787_vm4 = vcmp.eq.s32.totalorder %v757_v0, 1 }
  0xfc   :  { %v804_v18 = vsel %vm788_vm3, %v1724_v49, 0.0  ;;  %v803_v20 = vsel %vm787_vm4, %v1731_v59, 0.0  ;;  %v666_v44 = vrot.slane %v665_v26, 4 }
  0xfd   :  { %v1011_v14 = vrot.slane %v1010_v3, 1  ;;  %v466_v17 = vrot.slane %v465_v10, 2  ;;  %v848_v25 = vsel %vm258_vm7, %v804_v18, 0.0  ;;  %v847_v5 = vsel %vm258_vm7, %v803_v20, 0.0 }
  0xfe   :  { %v932_v6 = vpop.permute.xlu1 %931  ;;  %v929_v57 = vpop.permute.xlu0 %928  ;;  %v849_v34 = vadd.f32 %v848_v25, %v847_v5 }
  0xff   :  { %v1012_v58 = vadd.f32 %v1011_v14, %v1010_v3  ;;  %v467_v21 = vadd.f32 %v466_v17, %v465_v10  ;;  %vm968_vm5 = vcmp.eq.s32.totalorder %v932_v6, 1  ;;  %vm967_vm9 = vcmp.eq.s32.totalorder %v929_v57, 1 }
 0x100   :  { %v984_v61 = vsel %vm968_vm5, %v1714_v41, 0.0  ;;  %v983_v33 = vsel %vm967_vm9, %v1712_v32, 0.0  ;;  %v850_v46 = vrot.slane %v849_v34, 4 }
 0x101   :  { %v1861_v22 = vsel %vm1086_vm8, %v1012_v58, %v1003_v16  ;;  %v468_v13 = vrot.slane %v467_v21, 1  ;;  %v1014_v15 = vsel %vm258_vm7, %v984_v61, 0.0  ;;  %v1013_v39 = vsel %vm258_vm7, %v983_v33, 0.0 }
 0x102   :  { %v386_v23 = vpop.permute.xlu1 %385  ;;  %v383_v24 = vpop.permute.xlu0 %382  ;;  %v1015_v45 = vadd.f32 %v1014_v15, %v1013_v39  ;;  %v851_v42 = vadd.f32 %v850_v46, %v849_v34 }
 0x103   :  { %v469_v28 = vadd.f32 %v468_v13, %v467_v21  ;;  %vm418_vm10 = vcmp.eq.s32.totalorder %v386_v23, 1  ;;  %vm417_vm13 = vcmp.eq.s32.totalorder %v383_v24, 1 }
 0x104   :  { %v434_v35 = vsel %vm418_vm10, %v1754_v30, 0.0  ;;  %v433_v41 = vsel %vm417_vm13, %v1756_v31, 0.0  ;;  %v1016_v55 = vrot.slane %v1015_v45, 4  ;;  %v852_v18 = vrot.slane %v851_v42, 2 }
 0x105   :  { %v1870_v38 = vsel %vm1088_vm1, %v469_v28, %v1837_v2  ;;  %v471_v32 = vsel %vm258_vm7, %v434_v35, 0.0  ;;  %v470_v36 = vsel %vm258_vm7, %v433_v41, 0.0  ;;  %v667_v2 = vadd.f32 %v666_v44, %v665_v26 }
 0x106   :  { %v582_v11 = vpop.permute.xlu1 %581  ;;  %v579_v37 = vpop.permute.xlu0 %578  ;;  %v472_v50 = vadd.f32 %v471_v32, %v470_v36  ;;  %v1017_v16 = vadd.f32 %v1016_v55, %v1015_v45  ;;  %v853_v23 = vadd.f32 %v852_v18, %v851_v42 }
 0x107   :  { %vm606_vm8 = vcmp.eq.s32.totalorder %v582_v11, 1  ;;  %vm605_vm14 = vcmp.eq.s32.totalorder %v579_v37, 1  ;;  %v668_v3 = vrot.slane %v667_v2, 2 }
 0x108   :  { %v622_v51 = vsel %vm606_vm8, %v1763_v47, 0.0  ;;  %v621_v52 = vsel %vm605_vm14, %v1765_v48, 0.0  ;;  %v473_v43 = vrot.slane %v472_v50, 4  ;;  %v1018_v5 = vrot.slane %v1017_v16, 2 }
 0x109   :  { %v673_v63 = vsel %vm258_vm7, %v622_v51, 0.0  ;;  %v672_v0 = vsel %vm258_vm7, %v621_v52, 0.0  ;;  %v669_v57 = vadd.f32 %v668_v3, %v667_v2  ;;  %v854_v46 = vrot.slane %v853_v23, 1 }
 0x10a   :  { %v766_v53 = vpop.permute.xlu1 %765  ;;  %v763_v54 = vpop.permute.xlu0 %762  ;;  %v674_v62 = vadd.f32 %v673_v63, %v672_v0  ;;  %v474_v20 = vadd.f32 %v473_v43, %v472_v50  ;;  %v1019_v44 = vadd.f32 %v1018_v5, %v1017_v16  ;;  %v1900_v16 = vand.u32 127, %v46_v1 }
 0x10b   :  { %vm790_vm15 = vcmp.eq.s32.totalorder %v766_v53, 1  ;;  %vm789_vm0 = vcmp.eq.s32.totalorder %v763_v54, 1  ;;  %v670_v41 = vrot.slane %v669_v57, 1 }
 0x10c   :  { %v806_v56 = vsel %vm790_vm15, %v1763_v47, 0.0  ;;  %v805_v60 = vsel %vm789_vm0, %v1765_v48, 0.0  ;;  %v675_v26 = vrot.slane %v674_v62, 4  ;;  %v475_v24 = vrot.slane %v474_v20, 2 }
 0x10d   :  { %v857_v10 = vsel %vm258_vm7, %v806_v56, 0.0  ;;  %v856_v14 = vsel %vm258_vm7, %v805_v60, 0.0  ;;  %v671_v53 = vadd.f32 %v670_v41, %v669_v57  ;;  %v1020_v54 = vrot.slane %v1019_v44, 1 }
 0x10e   :  { %v938_v17 = vpop.permute.xlu1 %937  ;;  %v935_v8 = vpop.permute.xlu0 %934  ;;  %v858_v6 = vadd.f32 %v857_v10, %v856_v14  ;;  %v676_v32 = vadd.f32 %v675_v26, %v674_v62  ;;  %v476_v36 = vadd.f32 %v475_v24, %v474_v20 }
 0x10f   :  { %vm970_vm3 = vcmp.eq.s32.totalorder %v938_v17, 1  ;;  %vm969_vm4 = vcmp.eq.s32.totalorder %v935_v8, 1  ;;  %v855_v8 = vadd.f32 %v854_v46, %v853_v23  ;;  %v1021_v62 = vadd.f32 %v1020_v54, %v1019_v44 }
 0x110   :  { %v986_v13 = vsel %vm970_vm3, %v1754_v30, 0.0  ;;  %v985_v25 = vsel %vm969_vm4, %v1756_v31, 0.0  ;;  %v859_v28 = vrot.slane %v858_v6, 4  ;;  %v677_v55 = vrot.slane %v676_v32, 2 }
 0x111   :  { %v1023_v34 = vsel %vm258_vm7, %v986_v13, 0.0  ;;  %v1022_v35 = vsel %vm258_vm7, %v985_v25, 0.0  ;;  %v477_v56 = vrot.slane %v476_v36, 1 }
 0x112   :  { %v392_v58 = vpop.permute.xlu1 %391  ;;  %v389_v21 = vpop.permute.xlu0 %388  ;;  %v860_v11 = vadd.f32 %v859_v28, %v858_v6  ;;  %v1024_v37 = vadd.f32 %v1023_v34, %v1022_v35  ;;  %v678_v18 = vadd.f32 %v677_v55, %v676_v32 }
 0x113   :  { %vm420_vm5 = vcmp.eq.s32.totalorder %v392_v58, 1  ;;  %vm419_vm9 = vcmp.eq.s32.totalorder %v389_v21, 1  ;;  %v1093_v21 = vsel %vm1092_vm11, %v671_v53, %v1844_v19  ;;  %v478_v13 = vadd.f32 %v477_v56, %v476_v36  ;;  %v1910_v19 = vld [vmem:[#allocation2 + $0x78] sm:$0xff]  ;;  %v1920_v36 = vld [vmem:[#allocation2 + $0x70] sm:$0xff] }
 0x114   :  { %v436_v61 = vsel %vm420_vm5, %v1724_v49, 0.0  ;;  %v435_v33 = vsel %vm419_vm9, %v1731_v59, 0.0  ;;  %v861_v60 = vrot.slane %v860_v11, 2  ;;  %v1025_v42 = vrot.slane %v1024_v37, 4 }
 0x115   :  { %v480_v15 = vsel %vm258_vm7, %v436_v61, 0.0  ;;  %v479_v30 = vsel %vm258_vm7, %v435_v33, 0.0  ;;  %v679_v23 = vrot.slane %v678_v18, 1  ;;  %v1927_v46 = vsel %vm1090_vm6, %v478_v13, %v1870_v38 }
 0x116   :  { %v588_v31 = vpop.permute.xlu1 %587  ;;  %v585_v39 = vpop.permute.xlu0 %584  ;;  %v481_v45 = vadd.f32 %v480_v15, %v479_v30  ;;  %v862_v20 = vadd.f32 %v861_v60, %v860_v11  ;;  %v1026_v25 = vadd.f32 %v1025_v42, %v1024_v37  ;;  %v1138_v30 = vsel %vm1092_vm11, %v855_v8, %v1852_v27 }
 0x117   :  { %vm608_vm10 = vcmp.eq.s32.totalorder %v588_v31, 1  ;;  %vm607_vm13 = vcmp.eq.s32.totalorder %v585_v39, 1  ;;  %v680_v27 = vadd.f32 %v679_v23, %v678_v18 }
 0x118   :  { %v624_v51 = vsel %vm608_vm10, %v1771_v4, 0.0  ;;  %v623_v52 = vsel %vm607_vm13, %v1774_v7, 0.0  ;;  %v482_v43 = vrot.slane %v481_v45, 4  ;;  %v863_v35 = vrot.slane %v862_v20, 1 }
 0x119   :  { %v682_v63 = vsel %vm258_vm7, %v624_v51, 0.0  ;;  %v681_v0 = vsel %vm258_vm7, %v623_v52, 0.0 }
 0x11a   :  { %v772_v50 = vpop.permute.xlu1 %771  ;;  %v769_v2 = vpop.permute.xlu0 %768  ;;  %v683_v6 = vadd.f32 %v682_v63, %v681_v0  ;;  %v483_v5 = vadd.f32 %v482_v43, %v481_v45  ;;  %v864_v53 = vadd.f32 %v863_v35, %v862_v20 }
 0x11b   :  { %vm792_vm8 = vcmp.eq.s32.totalorder %v772_v50, 1  ;;  %vm791_vm14 = vcmp.eq.s32.totalorder %v769_v2, 1 }
 0x11c   :  { %v808_v3 = vsel %vm792_vm8, %v1771_v4, 0.0  ;;  %v807_v10 = vsel %vm791_vm14, %v1774_v7, 0.0  ;;  %v684_v15 = vrot.slane %v683_v6, 4  ;;  %v484_v31 = vrot.slane %v483_v5, 2 }
 0x11d   :  { %v866_v57 = vsel %vm258_vm7, %v808_v3, 0.0  ;;  %v865_v58 = vsel %vm258_vm7, %v807_v10, 0.0  ;;  %v1935_v10 = vsel %vm1094_vm12, %v680_v27, %v1093_v21 }
 0x11e   :  { %v944_v14 = vpop.permute.xlu1 %943  ;;  %v941_v17 = vpop.permute.xlu0 %940  ;;  %v867_v24 = vadd.f32 %v866_v57, %v865_v58  ;;  %v685_v50 = vadd.f32 %v684_v15, %v683_v6  ;;  %v485_v43 = vadd.f32 %v484_v31, %v483_v5  ;;  %v1940_v5 = vsel %vm1094_vm12, %v864_v53, %v1138_v30 }
 0x11f   :  { %vm972_vm15 = vcmp.eq.s32.totalorder %v944_v14, 1  ;;  %vm971_vm0 = vcmp.eq.s32.totalorder %v941_v17, 1 }
 0x120   :  { %v988_v1 = vsel %vm972_vm15, %v1724_v49, 0.0  ;;  %v987_v33 = vsel %vm971_vm0, %v1731_v59, 0.0  ;;  %v1916_v49 = vsel %vm1088_vm1, %v1021_v62, %v1861_v22  ;;  %v1027_v59 = vrot.slane %v1026_v25, 2 }
 0x121   :  { %v1032_v39 = vsel %vm258_vm7, %v988_v1, 0.0  ;;  %v1031_v41 = vsel %vm258_vm7, %v987_v33, 0.0  ;;  %v868_v45 = vrot.slane %v867_v24, 4  ;;  %v686_v14 = vrot.slane %v685_v50, 2 }
 0x122   :  { %v398_v26 = vpop.permute.xlu1 %397  ;;  %v395_v61 = vpop.permute.xlu0 %394  ;;  %v1033_v2 = vadd.f32 %v1032_v39, %v1031_v41  ;;  %v1028_v54 = vadd.f32 %v1027_v59, %v1026_v25  ;;  %v486_v25 = vrot.slane %v485_v43, 1 }
 0x123   :  { %vm422_vm3 = vcmp.eq.s32.totalorder %v398_v26, 1  ;;  %vm421_vm4 = vcmp.eq.s32.totalorder %v395_v61, 1  ;;  %v869_v0 = vadd.f32 %v868_v45, %v867_v24  ;;  %v687_v33 = vadd.f32 %v686_v14, %v685_v50 }
 0x124   :  { %v438_v28 = vsel %vm422_vm3, %v1763_v47, 0.0  ;;  %v437_v34 = vsel %vm421_vm4, %v1765_v48, 0.0  ;;  %v1034_v17 = vrot.slane %v1033_v2, 4  ;;  %v1029_v18 = vrot.slane %v1028_v54, 1 }
 0x125   :  { %v489_v11 = vsel %vm258_vm7, %v438_v28, 0.0  ;;  %v488_v37 = vsel %vm258_vm7, %v437_v34, 0.0  ;;  %v870_v21 = vrot.slane %v869_v0, 2  ;;  %v487_v30 = vadd.f32 %v486_v25, %v485_v43 }
 0x126   :  { %v594_v44 = vpop.permute.xlu1 %593  ;;  %v591_v32 = vpop.permute.xlu0 %590  ;;  %v490_v55 = vadd.f32 %v489_v11, %v488_v37  ;;  %v1035_v23 = vadd.f32 %v1034_v17, %v1033_v2  ;;  %v1030_v34 = vadd.f32 %v1029_v18, %v1028_v54  ;;  %v688_v11 = vrot.slane %v687_v33, 1 }
 0x127   :  { %vm610_vm5 = vcmp.eq.s32.totalorder %v594_v44, 1  ;;  %vm609_vm9 = vcmp.eq.s32.totalorder %v591_v32, 1  ;;  %v871_v44 = vadd.f32 %v870_v21, %v869_v0 }
 0x128   :  { %v626_v22 = vsel %vm610_vm5, %v1910_v19, 0.0  ;;  %v625_v52 = vsel %vm609_vm9, %v1920_v36, 0.0  ;;  %v491_v20 = vrot.slane %v490_v55, 4  ;;  %v1036_v37 = vrot.slane %v1035_v23, 2 }
 0x129   :  { %v691_v51 = vsel %vm258_vm7, %v626_v22, 0.0  ;;  %v690_v56 = vsel %vm258_vm7, %v625_v52, 0.0  ;;  %v1952_v53 = vsel %vm1090_vm6, %v1030_v34, %v1916_v49  ;;  %vm1098_vm5 = vcmask 1047559  }
 0x12a   :  { %v778_v60 = vpop.permute.xlu1 %777  ;;  %v775_v42 = vpop.permute.xlu0 %774  ;;  %v692_v63 = vadd.f32 %v691_v51, %v690_v56  ;;  %v492_v35 = vadd.f32 %v491_v20, %v490_v55  ;;  %v1956_v55 = vsel %vm1092_vm11, %v487_v30, %v1927_v46  ;;  %v872_v56 = vrot.slane %v871_v44, 1 }
 0x12b   :  { %vm794_vm1 = vcmp.eq.s32.totalorder %v778_v60, 1  ;;  %vm793_vm10 = vcmp.eq.s32.totalorder %v775_v42, 1  ;;  %v1961_v0 = vadd.f32 %v1036_v37, %v1035_v23 }
 0x12c   :  { %v810_v38 = vsel %vm794_vm1, %v1910_v19, 0.0  ;;  %v809_v3 = vsel %vm793_vm10, %v1920_v36, 0.0  ;;  %v693_v6 = vrot.slane %v692_v63, 4  ;;  %v493_v22 = vrot.slane %v492_v35, 2 }
 0x12d   :  { %v875_v8 = vsel %vm258_vm7, %v810_v38, 0.0  ;;  %v874_v62 = vsel %vm258_vm7, %v809_v3, 0.0 }
 0x12e   :  { %v876_v57 = vadd.f32 %v875_v8, %v874_v62  ;;  %v950_v58 = vpop.permute.xlu1 %949  ;;  %v947_v13 = vpop.permute.xlu0 %946  ;;  %v694_v15 = vadd.f32 %v693_v6, %v692_v63  ;;  %v1959_v63 = vadd.f32 %v688_v11, %v687_v33  ;;  %v494_v3 = vadd.f32 %v493_v22, %v492_v35 }
 0x12f   :  { %vm974_vm13 = vcmp.eq.s32.totalorder %v950_v58, 1  ;;  %vm973_vm8 = vcmp.eq.s32.totalorder %v947_v13, 1 }
 0x130   :  { %v877_v26 = vrot.slane %v876_v57, 4  ;;  %v990_v61 = vsel %vm974_vm13, %v1763_v47, 0.0  ;;  %v989_v1 = vsel %vm973_vm8, %v1765_v48, 0.0  ;;  %v695_v50 = vrot.slane %v694_v15, 2 }
 0x131   :  { %v1041_v24 = vsel %vm258_vm7, %v990_v61, 0.0  ;;  %v1040_v28 = vsel %vm258_vm7, %v989_v1, 0.0  ;;  %v495_v61 = vrot.slane %v494_v3, 1 }
 0x132   :  { %v1042_v59 = vadd.f32 %v1041_v24, %v1040_v28  ;;  %v404_v31 = vpop.permute.xlu1 %403  ;;  %v401_v39 = vpop.permute.xlu0 %400  ;;  %v878_v41 = vadd.f32 %v877_v26, %v876_v57  ;;  %v696_v14 = vadd.f32 %v695_v50, %v694_v15  ;;  %v1038_v26 = vrot.slane %v1961_v0, 1 }
 0x133   :  { %vm424_vm14 = vcmp.eq.s32.totalorder %v404_v31, 1  ;;  %vm423_vm15 = vcmp.eq.s32.totalorder %v401_v39, 1 }
 0x134   :  { %v1043_v47 = vrot.slane %v1042_v59, 4  ;;  %v440_v48 = vsel %vm424_vm14, %v1771_v4, 0.0  ;;  %v439_v32 = vsel %vm423_vm15, %v1774_v7, 0.0  ;;  %v879_v54 = vrot.slane %v878_v41, 2 }
 0x135   :  { %v498_v27 = vsel %vm258_vm7, %v440_v48, 0.0  ;;  %v497_v45 = vsel %vm258_vm7, %v439_v32, 0.0  ;;  %v697_v1 = vrot.slane %v696_v14, 1 }
 0x136   :  { %v499_v2 = vadd.f32 %v498_v27, %v497_v45  ;;  %v956_v51 = vpop.permute.xlu1 %955  ;;  %v953_v52 = vpop.permute.xlu0 %952  ;;  %v1044_v60 = vadd.f32 %v1043_v47, %v1042_v59  ;;  %v880_v18 = vadd.f32 %v879_v54, %v878_v41  ;;  %v496_v47 = vadd.f32 %v495_v61, %v494_v3 }
 0x137   :  { %vm976_vm0 = vcmp.eq.s32.totalorder %v956_v51, 1  ;;  %vm975_vm3 = vcmp.eq.s32.totalorder %v953_v52, 1  ;;  %v698_v48 = vadd.f32 %v697_v1, %v696_v14  ;;  %v1097_v3 = vsel %vm1096_vm2, %v1959_v63, %v1935_v10 }
 0x138   :  { %v500_v42 = vrot.slane %v499_v2, 4  ;;  %v992_v43 = vsel %vm976_vm0, %v1771_v4, 0.0  ;;  %v991_v49 = vsel %vm975_vm3, %v1774_v7, 0.0  ;;  %v873_v4 = vadd.f32 %v872_v56, %v871_v44 }
 0x139   :  { %v1050_v38 = vsel %vm258_vm7, %v992_v43, 0.0  ;;  %v1049_v8 = vsel %vm258_vm7, %v991_v49, 0.0  ;;  %v1045_v6 = vrot.slane %v1044_v60, 2  ;;  %v881_v28 = vrot.slane %v880_v18, 1 }
 0x13a   :  { %v501_v17 = vadd.f32 %v500_v42, %v499_v2  ;;  %v410_v46 = vpop.permute.xlu1 %409  ;;  %v407_v62 = vpop.permute.xlu0 %406  ;;  %v1051_v20 = vadd.f32 %v1050_v38, %v1049_v8  ;;  %v1039_v14 = vadd.f32 %v1038_v26, %v1961_v0  ;;  %v1163_v8 = vsel %vm1094_vm12, %v496_v47, %v1956_v55 }
 0x13b   :  { %vm426_vm6 = vcmp.eq.s32.totalorder %v410_v46, 1  ;;  %vm425_vm4 = vcmp.eq.s32.totalorder %v407_v62, 1  ;;  %v1046_v35 = vadd.f32 %v1045_v6, %v1044_v60  ;;  %v882_v22 = vadd.f32 %v881_v28, %v880_v18 }
 0x13c   :  { %v442_v57 = vsel %vm426_vm6, %v1910_v19, 0.0  ;;  %v441_v58 = vsel %vm425_vm4, %v1920_v36, 0.0  ;;  %v502_v13 = vrot.slane %v501_v17, 2  ;;  %v1052_v7 = vrot.slane %v1051_v20, 4 }
 0x13d   :  { %v507_v25 = vsel %vm258_vm7, %v442_v57, 0.0  ;;  %v506_v21 = vsel %vm258_vm7, %v441_v58, 0.0  ;;  %v1047_v54 = vrot.slane %v1046_v35, 1 }
 0x13e   :  { %v508_v33 = vadd.f32 %v507_v25, %v506_v21  ;;  %v962_v23 = vpop.permute.xlu1 %961  ;;  %v959_v24 = vpop.permute.xlu0 %958  ;;  %v1053_v34 = vadd.f32 %v1052_v7, %v1051_v20  ;;  %v503_v39 = vadd.f32 %v502_v13, %v501_v17 }
 0x13f   :  { %vm978_vm9 = vcmp.eq.s32.totalorder %v962_v23, 1  ;;  %vm977_vm1 = vcmp.eq.s32.totalorder %v959_v24, 1  ;;  %v1048_v6 = vadd.f32 %v1047_v54, %v1046_v35 }
 0x140   :  { %v509_v15 = vrot.slane %v508_v33, 4  ;;  %v994_v59 = vsel %vm978_vm9, %v1910_v19, 0.0  ;;  %v993_v31 = vsel %vm977_vm1, %v1920_v36, 0.0  ;;  %v1054_v30 = vrot.slane %v1053_v34, 2 }
 0x141   :  { %v1059_v41 = vsel %vm258_vm7, %v994_v59, 0.0  ;;  %v1058_v44 = vsel %vm258_vm7, %v993_v31, 0.0  ;;  %v504_v56 = vrot.slane %v503_v39, 1 }
 0x142   :  { %v510_v32 = vadd.f32 %v509_v15, %v508_v33  ;;  %v1060_v11 = vadd.f32 %v1059_v41, %v1058_v44  ;;  %v225_v37 = vpop.permute.xlu1 %224  ;;  %v222_v27 = vpop.permute.xlu0 %221  ;;  %v1055_v45 = vadd.f32 %v1054_v30, %v1053_v34  ;;  %v1244_v33 = vsel %vm1092_vm11, %v1039_v14, %v1952_v53 }
 0x143   :  { %vm241_vm10 = vcmp.eq.s32.totalorder %v225_v37, 1  ;;  %vm240_vm13 = vcmp.eq.s32.totalorder %v222_v27, 1  ;;  %v505_v10 = vadd.f32 %v504_v56, %v503_v39  ;;  %v1245_v28 = vsel %vm1094_vm12, %v1048_v6, %v1244_v33 }
 0x144   :  { %v511_v50 = vrot.slane %v510_v32, 2  ;;  %v1061_v2 = vrot.slane %v1060_v11, 4  ;;  %v257_v51 = vsel %vm241_vm10, %v1910_v19, 0.0  ;;  %v256_v52 = vsel %vm240_vm13, %v1920_v36, 0.0 }
 0x145   :  { %v323_v60 = vsel %vm258_vm7, %v257_v51, 0.0  ;;  %v322_v42 = vsel %vm258_vm7, %v256_v52, 0.0  ;;  %v1140_v19 = vsel %vm1096_vm2, %v873_v4, %v1940_v5  ;;  %v1986_v36 = vsel %vm1098_vm5, %v698_v48, %v1097_v3 }
 0x146   :  { %v512_v43 = vadd.f32 %v511_v50, %v510_v32  ;;  %v1062_v38 = vadd.f32 %v1061_v2, %v1060_v11  ;;  %v324_v49 = vadd.f32 %v323_v60, %v322_v42  ;;  %v1056_v46 = vrot.slane %v1055_v45, 1 }
 0x147   :  { %v1071_v17 = vpop.permute.xlu0 %1070  ;;  %v1141_v0 = vsel %vm1098_vm5, %v882_v22, %v1140_v19  ;;  %v1164_v23 = vsel %vm1096_vm2, %v505_v10, %v1163_v8  ;;  %vm1288_vm12 = vcmp.lt.s32.totalorder %v1464_v12, 14 }
 0x148   :  { %v1063_v62 = vrot.slane %v1062_v38, 2  ;;  %v325_v18 = vrot.slane %v324_v49, 4  ;;  %v1991_v20 = vsub.s32 %v1900_v16, %v1071_v17  ;;  %v513_v63 = vrot.slane %v512_v43, 1 }
 0x149   :  { %v1057_v7 = vadd.f32 %v1056_v46, %v1055_v45  ;;  %v1295_v42 = vsel %vm1288_vm12, 1, %v1424_v29 }
 0x14a   :  { %v1064_v57 = vadd.f32 %v1063_v62, %v1062_v38  ;;  %v326_v58 = vadd.f32 %v325_v18, %v324_v49  ;;  %vm1076_vm8 = vcmp.eq.s32.totalorder %v1991_v20, 1  ;;  %vm1075_vm14 = vcmp.eq.s32.totalorder %v1991_v20, 0 }
 0x14b   :  { %v1197_v5 = vsel %vm1076_vm8, %v1141_v0, 0.0  ;;  %v1101_v55 = vsel %vm1075_vm14, %v1986_v36, 0.0  ;;  %vm1077_vm15 = vcmp.eq.s32.totalorder %v1991_v20, 2  ;;  %vm1074_vm0 = vcmp.eq.s32.totalorder %v1991_v20, 4294967295 }
 0x14c   :  { %v327_v16 = vrot.slane %v326_v58, 2  ;;  %v1198_v4 = vsel %vm258_vm7, %v1197_v5, 0.0  ;;  %v1102_v13 = vsel %vm258_vm7, %v1101_v55, 0.0  ;;  %v1177_v25 = vsel %vm1077_vm15, %v1986_v36, 0.0 }
 0x14d   :  { %1199 = vadd.xlane.f32.xlu0 %v1198_v4  ;;  %1103 = vadd.xlane.f32.xlu1 %v1102_v13  ;;  %v1205_v21 = vsel %vm1074_vm0, %v1141_v0, 0.0  ;;  %v1065_v26 = vrot.slane %v1064_v57, 1  ;;  %v514_v61 = vadd.f32 %v513_v63, %v512_v43  ;;  %v1178_v35 = vsel %vm258_vm7, %v1177_v25, 0.0 }
 0x14e   :  { %v328_v1 = vadd.f32 %v327_v16, %v326_v58  ;;  %v1206_v15 = vsel %vm258_vm7, %v1205_v21, 0.0  ;;  %v1246_v59 = vsel %vm1096_vm2, %v1057_v7, %v1245_v28  ;;  %vm1073_vm11 = vcmp.eq.s32.totalorder %v1991_v20, 4294967294 }
 0x14f   :  { %v1066_v24 = vadd.f32 %v1065_v26, %v1064_v57  ;;  %v1165_v34 = vsel %vm1098_vm5, %v514_v61, %v1164_v23  ;;  %v1187_v32 = vsel %vm1073_vm11, %v1986_v36, 0.0  ;;  %v1109_v45 = vsel %vm1076_vm8, %v1986_v36, 0.0 }
 0x150   :  { %v329_v31 = vrot.slane %v328_v1, 1  ;;  %v1214_v53 = vsel %vm1076_vm8, %v1165_v34, 0.0  ;;  %v1223_v48 = vsel %vm1074_vm0, %v1165_v34, 0.0  ;;  %v1188_v27 = vsel %vm258_vm7, %v1187_v32, 0.0 }
 0x151   :  { %1179 = vadd.xlane.f32.xlu0 %v1178_v35  ;;  %1207 = vadd.xlane.f32.xlu1 %v1206_v15  ;;  %v1247_v39 = vsel %vm1098_vm5, %v1066_v24, %v1246_v59  ;;  %v1215_v47 = vsel %vm258_vm7, %v1214_v53, 0.0  ;;  %v1224_v37 = vsel %vm258_vm7, %v1223_v48, 0.0  ;;  %v1110_v50 = vsel %vm258_vm7, %v1109_v45, 0.0 }
 0x152   :  { %v1249_v30 = vsel %vm1075_vm14, %v1247_v39, 0.0  ;;  %v330_v41 = vadd.f32 %v329_v31, %v328_v1  ;;  %v1117_v51 = vsel %vm1074_vm0, %v1986_v36, 0.0  ;;  %v1167_v56 = vsel %vm1075_vm14, %v1165_v34, 0.0 }
 0x153   :  { %v1250_v44 = vsel %vm258_vm7, %v1249_v30, 0.0  ;;  %v1118_v54 = vsel %vm258_vm7, %v1117_v51, 0.0  ;;  %v1168_v60 = vsel %vm258_vm7, %v1167_v56, 0.0  ;;  %vm1287_vm2 = vcmp.gt.s32.totalorder %v1464_v12, 1 }
 0x154   :  { %v1272_v11 = vsel %vm1098_vm5, %v330_v41, %v1805_v40  ;;  %v1143_v40 = vsel %vm1075_vm14, %v1141_v0, 0.0  ;;  %v1290_v43 = vsel %vm1287_vm2, 1, %v1424_v29  ;;  %vm1289_vm11 = vmand %vm1287_vm2, %vm1288_vm12 }
 0x155   :  { %1251 = vadd.xlane.f32.xlu0 %v1250_v44  ;;  %1216 = vadd.xlane.f32.xlu1 %v1215_v47  ;;  %v1274_v22 = vsel %vm1075_vm14, %v1272_v11, 0.0  ;;  %v1144_v52 = vsel %vm258_vm7, %v1143_v40, 0.0 }
 0x156   :  { %v1275_v2 = vsel %vm258_vm7, %v1274_v22, 0.0 }
 0x159   :  { %1225 = vadd.xlane.f32.xlu0 %v1224_v37  ;;  %1189 = vadd.xlane.f32.xlu1 %v1188_v27 }
 0x15d   :  { %1111 = vadd.xlane.f32.xlu0 %v1110_v50  ;;  %1276 = vadd.xlane.f32.xlu1 %v1275_v2 }
 0x161   :  { %1145 = vadd.xlane.f32.xlu0 %v1144_v52  ;;  %1119 = vadd.xlane.f32.xlu1 %v1118_v54 }
 0x165   :  { %1169 = vadd.xlane.f32.xlu1 %v1168_v60 }
 0x176   :  { %1296 = vrot.lane.b32.xlu1 %v1295_v42, %s1425_s0 }
 0x177   :  { %1291 = vrot.lane.b32.xlu0 %v1290_v43, %s1425_s0 }
 0x1da   :  { %v1200_v38 = vpop.xlane.xlu0 %1199  ;;  %v1104_v49 = vpop.xlane.xlu1 %1103 }
 0x1db   :  { %vm1105_vm7 = vcmp.eq.f32.partialorder %v1104_v49, 0.0  ;;  %vm1201_vm3 = vcmp.eq.f32.partialorder %v1200_v38, 0.0 }
 0x1dc   :  { %v1106_v17 = vsel %vm1105_vm7, 1e-10, %v1104_v49  ;;  %v1202_v36 = vsel %vm1201_vm3, 1e-10, %v1200_v38 }
 0x1de   :  { %v1180_v3 = vpop.xlane.xlu0 %1179  ;;  %v1208_v14 = vpop.xlane.xlu1 %1207 }
 0x1df   :  { %vm1181_vm6 = vcmp.eq.f32.partialorder %v1180_v3, 0.0  ;;  %vm1209_vm4 = vcmp.eq.f32.partialorder %v1208_v14, 0.0 }
 0x1e0   :  { %v1210_v19 = vsel %vm1209_vm4, 1e-10, %v1208_v14  ;;  %v1182_v8 = vsel %vm1181_vm6, 1e-10, %v1180_v3 }
 0x1e1   :  { %1367 = vlog2.f32 %v1210_v19 }
 0x1e2   :  { %v1252_v46 = vpop.xlane.xlu0 %1251  ;;  %v1217_v29 = vpop.xlane.xlu1 %1216  ;;  %1369 = vlog2.f32 %v1106_v17 }
 0x1e3   :  { %vm1253_vm5 = vcmp.eq.f32.partialorder %v1252_v46, 0.0  ;;  %vm1218_vm9 = vcmp.eq.f32.partialorder %v1217_v29, 0.0  ;;  %1371 = vlog2.f32 %v1202_v36 }
 0x1e4   :  { %v1219_v62 = vsel %vm1218_vm9, 1e-10, %v1217_v29  ;;  %1373 = vlog2.f32 %v1182_v8  ;;  %v1254_v18 = vsel %vm1253_vm5, 1e-10, %v1252_v46  ;;  %vm1339_vm5 = vcmask 7168  }
 0x1e5   :  { %1375 = vlog2.f32 %v1219_v62  ;;  %vm1345_vm9 = vcmask 15368  }
 0x1e6   :  { %v1226_v20 = vpop.xlane.xlu0 %1225  ;;  %v1190_v6 = vpop.xlane.xlu1 %1189  ;;  %1377 = vlog2.f32 %v1254_v18 }
 0x1e7   :  { %vm1227_vm1 = vcmp.eq.f32.partialorder %v1226_v20, 0.0  ;;  %vm1191_vm10 = vcmp.eq.f32.partialorder %v1190_v6, 0.0 }
 0x1e8   :  { %v1228_v10 = vsel %vm1227_vm1, 1e-10, %v1226_v20  ;;  %v1192_v63 = vsel %vm1191_vm10, 1e-10, %v1190_v6 }
 0x1e9   :  { %1379 = vlog2.f32 %v1228_v10 }
 0x1ea   :  { %1381 = vlog2.f32 %v1192_v63  ;;  %v1112_v0 = vpop.xlane.xlu0 %1111  ;;  %v1277_v57 = vpop.xlane.xlu1 %1276 }
 0x1eb   :  { %vm1113_vm13 = vcmp.eq.f32.partialorder %v1112_v0, 0.0  ;;  %vm1278_vm8 = vcmp.eq.f32.partialorder %v1277_v57, 0.0  ;;  %v1368_v58 = vpop.eup %1367 }
 0x1ec   :  { %v1279_v5 = vsel %vm1278_vm8, 1e-10, %v1277_v57  ;;  %v1370_v55 = vpop.eup %1369  ;;  %v1114_v16 = vsel %vm1113_vm13, 1e-10, %v1112_v0  ;;  %v1212_v21 = vmul.f32 0.6931472, %v1368_v58 }
 0x1ed   :  { %v1372_v4 = vpop.eup %1371  ;;  %1383 = vlog2.f32 %v1279_v5  ;;  %v1108_v61 = vmul.f32 0.6931472, %v1370_v55 }
 0x1ee   :  { %v1146_v13 = vpop.xlane.xlu0 %1145  ;;  %v1120_v7 = vpop.xlane.xlu1 %1119  ;;  %1385 = vlog2.f32 %v1114_v16  ;;  %v1204_v23 = vmul.f32 0.6931472, %v1372_v4 }
 0x1ef   :  { %v1374_v25 = vpop.eup %1373  ;;  %vm1147_vm14 = vcmp.eq.f32.partialorder %v1146_v13, 0.0  ;;  %vm1121_vm15 = vcmp.eq.f32.partialorder %v1120_v7, 0.0  ;;  %v1185_v39 = vmul.f32 2.0, %v1108_v61 }
 0x1f0   :  { %v1376_v26 = vpop.eup %1375  ;;  %v1148_v1 = vsel %vm1147_vm14, 1e-10, %v1146_v13  ;;  %v1122_v33 = vsel %vm1121_vm15, 1e-10, %v1120_v7  ;;  %v1184_v15 = vmul.f32 0.6931472, %v1374_v25  ;;  %v1213_v59 = vsub.f32 %v1204_v23, %v1212_v21 }
 0x1f1   :  { %v1221_v24 = vmul.f32 0.6931472, %v1376_v26  ;;  %v1378_v28 = vpop.eup %1377  ;;  %1387 = vlog2.f32 %v1122_v33 }
 0x1f2   :  { %v1170_v34 = vpop.xlane.xlu1 %1169  ;;  %1389 = vlog2.f32 %v1148_v1  ;;  %v1256_v41 = vmul.f32 0.6931472, %v1378_v28  ;;  %v1186_v48 = vsub.f32 %v1184_v15, %v1185_v39  ;;  %v1292_v37 = vpop.permute.xlu0 %1291 }
 0x1f3   :  { %v1380_v35 = vpop.eup %1379  ;;  %vm1171_vm0 = vcmp.eq.f32.partialorder %v1170_v34, 0.0  ;;  %v1222_v44 = vsub.f32 %v1213_v59, %v1221_v24  ;;  %vm1293_vm7 = vcmp.ne.s32.totalorder %v1292_v37, 0 }
 0x1f4   :  { %v1382_v31 = vpop.eup %1381  ;;  %v1230_v53 = vmul.f32 0.6931472, %v1380_v35  ;;  %v1172_v30 = vsel %vm1171_vm0, 1e-10, %v1170_v34  ;;  %v1257_v27 = vsub.f32 %v1256_v41, %v1185_v39  ;;  %vm1294_vm3 = vmand %vm1289_vm11, %vm1293_vm7 }
 0x1f5   :  { %v1194_v47 = vmul.f32 0.6931472, %v1382_v31  ;;  %1391 = vlog2.f32 %v1172_v30 }
 0x1f6   :  { %v1231_v32 = vadd.f32 %v1230_v53, %v1222_v44  ;;  %v1297_v51 = vpop.permute.xlu1 %1296 }
 0x1f7   :  { %v1384_v11 = vpop.eup %1383  ;;  %v1195_v45 = vadd.f32 %v1194_v47, %v1186_v48  ;;  %vm1298_vm6 = vcmp.ne.s32.totalorder %v1297_v51, 0 }
 0x1f8   :  { %v1281_v22 = vmul.f32 0.6931472, %v1384_v11  ;;  %v1386_v50 = vpop.eup %1385  ;;  %v1232_v2 = vmul.f32 0.25, %v1231_v32  ;;  %vm1299_vm4 = vmand %vm1294_vm3, %vm1298_vm6 }
 0x1f9   :  { %v1196_v56 = vmul.f32 0.25, %v1195_v45  ;;  %v1116_v60 = vmul.f32 0.6931472, %v1386_v50 }
 0x1fa   :  { %v1282_v40 = vadd.f32 %v1281_v22, %v1257_v27  ;;  %v1285_v14 = vmul.f32 %v1232_v2, %v1232_v2  ;;  %v1310_v6 = vsub.f32 0.0, %v1232_v2 }
 0x1fb   :  { %v1388_v52 = vpop.eup %1387 }
 0x1fc   :  { %v1390_v54 = vpop.eup %1389  ;;  %v1283_v42 = vmul.f32 0.25, %v1282_v40  ;;  %v1124_v43 = vmul.f32 0.6931472, %v1388_v52 }
 0x1fd   :  { %v1150_v17 = vmul.f32 0.6931472, %v1390_v54 }
 0x1fe   :  { %v1125_v49 = vsub.f32 %v1116_v60, %v1124_v43  ;;  %v1284_v3 = vmul.f32 %v1283_v42, %v1196_v56 }
 0x1ff   :  { %v1392_v38 = vpop.eup %1391 }
 0x200   :  { %v1174_v19 = vmul.f32 0.6931472, %v1392_v38  ;;  %v1126_v36 = vmul.f32 0.5, %v1125_v49  ;;  %v1286_v8 = vsub.f32 %v1284_v3, %v1285_v14 }
 0x202   :  { %v1175_v12 = vsub.f32 %v1150_v17, %v1174_v19  ;;  %v1305_v46 = vmul.f32 %v1283_v42, %v1126_v36  ;;  %vm1300_vm12 = vcmp.ne.f32.partialorder %v1286_v8, 0.0  ;;  %v1311_v0 = vmul.f32 %v1310_v6, %v1126_v36 }
 0x203   :  { %vm2062_vm2 = vmand %vm1299_vm4, %vm1300_vm12 }
 0x204   :  { %v1176_v29 = vmul.f32 0.5, %v1175_v12  ;;  %v1302_v18 = vsel %vm2062_vm2, %v1286_v8, 1.0 }
 0x205   :  { %1393 = vrcp.f32 %v1302_v18 }
 0x206   :  { %v1306_v20 = vmul.f32 %v1232_v2, %v1176_v29  ;;  %v1312_v10 = vmul.f32 %v1196_v56, %v1176_v29 }
 0x208   :  { %v1307_v63 = vsub.f32 %v1305_v46, %v1306_v20  ;;  %v1313_v57 = vadd.f32 %v1312_v10, %v1311_v0 }
 0x20a   :  { %v1308_v58 = vsub.f32 0.0, %v1307_v63  ;;  %v1314_v5 = vsub.f32 0.0, %v1313_v57 }
 0x20f   :  { %v1394_v55 = vpop.eup %1393 }
 0x210   :  { %v1309_v16 = vmul.f32 %v1394_v55, %v1308_v58  ;;  %v1315_v4 = vmul.f32 %v1394_v55, %v1314_v5 }
 0x212   :  { %1319 = vrot.lane.b32.xlu1 %v1315_v4, %s1426_s1  ;;  %v1316_v13 = vadd.f32 %v1309_v16, %v1460_v9 }
 0x214   :  { %v1317_v7 = vsel %vm2062_vm2, %v1316_v13, %v1460_v9 }
 0x215   :  { %v1333_v25 = vmul.f32 0.0625, %v1317_v7 }
 0x216   :  { %1328 = vrot.lane.b32.xlu1 %v1460_v9, %s1425_s0 }
 0x217   :  { %v1334_v26 = vmul.f32 2.0, %v1333_v25 }
 0x219   :  { %v1352_v1 = vadd.f32 -1.0, %v1334_v26 }
 0x284   :  { %v1320_v21 = vpop.permute.xlu1 %1319 }
 0x285   :  { %v1322_v61 = vadd.f32 %v1320_v21, %v1460_v9 }
 0x287   :  { %1324 = vrot.lane.b32.xlu0 %v1322_v61, %s1425_s0 }
 0x288   :  { %v1329_v33 = vpop.permute.xlu1 %1328 }
 0x28b   :  { %1342 = vrot.lane.b32.xlu0 %v1352_v1, %s1426_s1 }
 0x2f9   :  { %v1325_v23 = vpop.permute.xlu0 %1324 }
 0x2fa   :  { %v1331_v24 = vsel %vm2062_vm2, %v1325_v23, %v1329_v33 }
 0x2fb   :  { %v1336_v28 = vmul.f32 0.0625, %v1331_v24 }
 0x2fd   :  { %v1337_v34 = vmul.f32 2.0, %v1336_v28  ;;  %v1343_v15 = vpop.permute.xlu0 %1342 }
 0x2ff   :  { %v1353_v35 = vadd.f32 -1.0, %v1337_v34 }
 0x301   :  { %1340 = vst.msk [vmem:[%s2086_s2] sm:$0xff] %vm1339_vm5, %v1353_v35 }
 0x302   :  { %1346 = vst.msk [vmem:[%s2086_s2] sm:$0xff] %vm1345_vm9, %v1343_v15 }
 0x303   :  { %1351 = vsyncpa [#allocation3], 1 }

</bundles_post_ra>
